<compile_context>
chip_gen: v7x
topology: tpu7x:2x2x1
jax: 0.10.0
libtpu: 0.0.40
codegen_flags: <defaults>
</compile_context>

<pallas_src>
import jax
import jax.numpy as jnp
from jax.experimental import pallas as pl
from jax.experimental.pallas import tpu as pltpu


def _round_up(x, m):
    return ((x + m - 1) // m) * m


def _make_kernel_c1(D, compute_dtype):
    """n_classes == 1: fused gate matmul + VPU/XLU second projection."""
    def kernel(x_ref, wab_ref, bab_ref, wct_ref, bc_ref, a_ref):
        x = x_ref[...]
        if x.dtype != compute_dtype:
            x = x.astype(compute_dtype)            # in-kernel cast: no extra HBM pass
        # One fused MXU matmul: [tile_n, L] @ [L, 2D], f32 accumulation.
        h = jnp.dot(x, wab_ref[...], preferred_element_type=jnp.float32)
        h = h + bab_ref[...]
        ha = jnp.tanh(h[:, :D])                    # f32 epilogue (EUP slot)
        hb = jax.nn.sigmoid(h[:, D:])              # lane-aligned split (D % 128 == 0)
        g = ha * hb                                # (tile_n, D) f32
        # [D, 1] RHS would waste the MXU; VPU multiply + lane reduce instead.
        a = jnp.sum(g * wct_ref[...], axis=-1, keepdims=True) + bc_ref[...]
        a_ref[...] = a.astype(a_ref.dtype)
    return kernel


def _make_kernel_mxu(D, compute_dtype):
    """General n_classes: fused gate matmul + MXU second projection (f32)."""
    def kernel(x_ref, wab_ref, bab_ref, wc_ref, bc_ref, a_ref):
        x = x_ref[...]
        if x.dtype != compute_dtype:
            x = x.astype(compute_dtype)
        h = jnp.dot(x, wab_ref[...], preferred_element_type=jnp.float32)
        h = h + bab_ref[...]
        ha = jnp.tanh(h[:, :D])
        hb = jax.nn.sigmoid(h[:, D:])
        g = ha * hb                                # stays f32 (no extra logit rounding)
        a = jnp.dot(g, wc_ref[...], preferred_element_type=jnp.float32) + bc_ref[...]
        a_ref[...] = a.astype(a_ref.dtype)
    return kernel


def attn_net_gated_forward(x, wa, ba, wb, bb, wc, bc, *,
                           tile_n=2048,
                           min_grid_steps=2,
                           compute_dtype=jnp.bfloat16,
                           vmem_limit_bytes=48 * 1024 * 1024):
    """Gated attention net forward.

    x:  [N, L]      (bag of N instances, feature dim L on the lane axis)
    wa: [L, D], ba: [1, D]   -> attention_a (tanh branch)
    wb: [L, D], bb: [1, D]   -> attention_b (sigmoid branch)
    wc: [D, C], bc: [1, C]   -> attention_c
    Returns (A [N, C], x) matching Attn_Net_Gated.forward.

    On v5e/v6e (128 MiB VMEM) sweep tile_n up to 4096-8192 and raise
    vmem_limit_bytes; on v7x keep tile_n <= ~2048-4096 (64 MiB VMEM / TC).
    """
    N, L = x.shape
    D = wa.shape[1]
    C = wc.shape[1]

    # Row tile: multiple of 16 (bf16 sublane packing). Keep >= min_grid_steps
    # steps for medium/large bags (v7x megacore sharding), never exceed the bag.
    tile_n = max(16, _round_up(tile_n, 16))
    if N > 16 * min_grid_steps:
        tile_n = min(tile_n, _round_up(pl.cdiv(N, min_grid_steps), 16))
    tile_n = min(tile_n, _round_up(N, 16))
    grid_n = pl.cdiv(N, tile_n)

    # Fused gate weights: one [L, 2D] MXU matmul per tile (weights are tiny,
    # so this wrapper-side concat/cast is negligible; x is NOT touched here).
    wab = jnp.concatenate([wa, wb], axis=1).astype(compute_dtype)
    bab = jnp.concatenate([ba, bb], axis=1).astype(jnp.float32)
    bc_c = bc.astype(jnp.float32)

    if C == 1:
        kernel = _make_kernel_c1(D, compute_dtype)
        wc_k = wc.astype(jnp.float32).T                   # (1, D), lane-dense
        wc_spec = pl.BlockSpec((1, D), lambda i: (0, 0))
    else:
        kernel = _make_kernel_mxu(D, compute_dtype)
        wc_k = wc.astype(jnp.float32)                     # (D, C), f32 keeps accuracy
        wc_spec = pl.BlockSpec((D, C), lambda i: (0, 0))

    a = pl.pallas_call(
        kernel,
        out_shape=jax.ShapeDtypeStruct((N, C), x.dtype),
        grid_spec=pltpu.PrefetchScalarGridSpec(
            num_scalar_prefetch=0,
            grid=(grid_n,),
            in_specs=[
                pl.BlockSpec((tile_n, L), lambda i: (i, 0)),    # x (streamed, cast in-kernel)
                pl.BlockSpec((L, 2 * D), lambda i: (0, 0)),     # [W_a | W_b] (resident)
                pl.BlockSpec((1, 2 * D), lambda i: (0, 0)),     # [b_a | b_b]
                wc_spec,                                        # W_c
                pl.BlockSpec((1, C), lambda i: (0, 0)),         # b_c
            ],
            out_specs=pl.BlockSpec((tile_n, C), lambda i: (i, 0)),
        ),
        compiler_params=pltpu.CompilerParams(
            dimension_semantics=("parallel",),
            vmem_limit_bytes=vmem_limit_bytes),
    )(x, wab, bab, wc_k, bc_c)

    return a, x


def init_params(key, L, D, C, dtype=jnp.float32):
    """PyTorch-Linear-like uniform init; weights stored transposed to [in, out]."""
    ka, kb, kc = jax.random.split(key, 3)

    def linear(k, fan_in, fan_out):
        kw, kbias = jax.random.split(k)
        lim = 1.0 / float(fan_in) ** 0.5
        w = jax.random.uniform(kw, (fan_in, fan_out), dtype, -lim, lim)
        b = jax.random.uniform(kbias, (1, fan_out), dtype, -lim, lim)
        return w, b

    wa, ba = linear(ka, L, D)
    wb, bb = linear(kb, L, D)
    wc, bc = linear(kc, D, C)
    return wa, ba, wb, bb, wc, bc


def _reference(x, wa, ba, wb, bb, wc, bc):
    a = jnp.tanh(x @ wa + ba)
    b = jax.nn.sigmoid(x @ wb + bb)
    return (a * b) @ wc + bc


if __name__ == "__main__":
    # Module defaults: L=1024, D=256, n_classes=1. Ragged bag N=300 exercises
    # the cdiv grid, partial last block, and the >=2-step tile clamp.
    N, L, D, C = 300, 1024, 256, 1
    key = jax.random.PRNGKey(0)
    kx, kp, kp2 = jax.random.split(key, 3)
    x = jax.random.normal(kx, (N, L), jnp.float32)
    wa, ba, wb, bb, wc, bc = init_params(kp, L, D, C)
    a_ref = _reference(x, wa, ba, wb, bb, wc, bc)

    # Default config: bf16 MXU inputs (cast in-kernel), f32 accumulation.
    a_bf16, x_out = attn_net_gated_forward(x, wa, ba, wb, bb, wc, bc)
    jax.block_until_ready((a_bf16, x_out))
    assert a_bf16.shape == (N, C)
    assert x_out.shape == (N, L)
    assert jnp.array_equal(x_out, x)
    assert jnp.allclose(a_bf16, a_ref, atol=5e-2, rtol=5e-2)

    # Multi-step grid with a partial (44-row) last block.
    a_small, _ = attn_net_gated_forward(x, wa, ba, wb, bb, wc, bc, tile_n=128)
    jax.block_until_ready(a_small)
    assert jnp.allclose(a_small, a_ref, atol=5e-2, rtol=5e-2)

    # Full f32 compute path (x dtype == compute_dtype -> no in-kernel cast).
    a_f32, _ = attn_net_gated_forward(x, wa, ba, wb, bb, wc, bc,
                                      compute_dtype=jnp.float32)
    jax.block_until_ready(a_f32)
    assert jnp.allclose(a_f32, a_ref, atol=2e-2, rtol=2e-2)

    # n_classes > 1 path (second projection on the MXU, f32 W_c).
    C2 = 4
    wa2, ba2, wb2, bb2, wc2, bc2 = init_params(kp2, L, D, C2)
    a2, _ = attn_net_gated_forward(x, wa2, ba2, wb2, bb2, wc2, bc2, tile_n=128,
                                   compute_dtype=jnp.float32)
    jax.block_until_ready(a2)
    a2_ref = _reference(x, wa2, ba2, wb2, bb2, wc2, bc2)
    assert a2.shape == (N, C2)
    assert jnp.allclose(a2, a2_ref, atol=2e-2, rtol=2e-2)

    print("KERNEL_OK")
</pallas_src>

<mosaic_0001>
module attributes {stable_mosaic.version = 11 : i64} {
  func.func @kernel(%arg0: i32, %arg1: memref<160x1024xf32, #tpu.memory_space<vmem>>, %arg2: memref<1024x512xbf16, #tpu.memory_space<vmem>>, %arg3: memref<1x512xf32, #tpu.memory_space<vmem>>, %arg4: memref<1x256xf32, #tpu.memory_space<vmem>>, %arg5: memref<1x1xf32, #tpu.memory_space<vmem>>, %arg6: memref<160x1xf32, #tpu.memory_space<vmem>>) attributes {dimension_semantics = [#tpu.dimension_semantics<parallel>], iteration_bounds = array<i64: 2>, scalar_prefetch = 0 : i64, scratch_operands = 0 : i64, tpu.core_type = #tpu.core_type<tc>, window_params = [{transform_indices = @transform_0, window_bounds = array<i64: 160, 1024>}, {pipeline_mode = #tpu.pipeline_mode<synchronous>, transform_indices = @transform_1, window_bounds = array<i64: 1024, 512>}, {pipeline_mode = #tpu.pipeline_mode<synchronous>, transform_indices = @transform_2, window_bounds = array<i64: 1, 512>}, {pipeline_mode = #tpu.pipeline_mode<synchronous>, transform_indices = @transform_3, window_bounds = array<i64: 1, 256>}, {pipeline_mode = #tpu.pipeline_mode<synchronous>, transform_indices = @transform_4, window_bounds = array<i64: 1, 1>}, {transform_indices = @transform_5, window_bounds = array<i64: 160, 1>}]} {
    %c0 = arith.constant 0 : index
    %c0_0 = arith.constant 0 : index
    %0 = vector.load %arg1[%c0, %c0_0] : memref<160x1024xf32, #tpu.memory_space<vmem>>, vector<160x1024xf32>
    %1 = arith.truncf %0 : vector<160x1024xf32> to vector<160x1024xbf16>
    %c0_1 = arith.constant 0 : index
    %c0_2 = arith.constant 0 : index
    %2 = vector.load %arg2[%c0_1, %c0_2] : memref<1024x512xbf16, #tpu.memory_space<vmem>>, vector<1024x512xbf16>
    %cst = arith.constant dense<0.000000e+00> : vector<160x512xf32>
    %3 = tpu.matmul %1, %2, %cst {dimension_numbers = #tpu.dot_dimension_numbers<[1], [0], [0], [1], [0, 0, 1, 1], [], []>} : vector<160x1024xbf16>, vector<1024x512xbf16>, vector<160x512xf32> -> vector<160x512xf32>
    %c0_3 = arith.constant 0 : index
    %c0_4 = arith.constant 0 : index
    %4 = vector.load %arg3[%c0_3, %c0_4] : memref<1x512xf32, #tpu.memory_space<vmem>>, vector<1x512xf32>
    %5 = vector.broadcast %4 : vector<1x512xf32> to vector<160x512xf32>
    %6 = arith.addf %3, %5 : vector<160x512xf32>
    %7 = vector.extract_strided_slice %6 {offsets = [0, 0], sizes = [160, 256], strides = [1, 1]} : vector<160x512xf32> to vector<160x256xf32>
    %8 = math.tanh %7 : vector<160x256xf32>
    %9 = vector.extract_strided_slice %6 {offsets = [0, 256], sizes = [160, 256], strides = [1, 1]} : vector<160x512xf32> to vector<160x256xf32>
    %10 = arith.negf %9 : vector<160x256xf32>
    %11 = math.exp %10 : vector<160x256xf32>
    %cst_5 = arith.constant 1.000000e+00 : f32
    %12 = vector.broadcast %cst_5 : f32 to vector<160x256xf32>
    %13 = arith.addf %12, %11 : vector<160x256xf32>
    %14 = arith.divf %12, %13 : vector<160x256xf32>
    %15 = arith.mulf %8, %14 : vector<160x256xf32>
    %c0_6 = arith.constant 0 : index
    %c0_7 = arith.constant 0 : index
    %16 = vector.load %arg4[%c0_6, %c0_7] : memref<1x256xf32, #tpu.memory_space<vmem>>, vector<1x256xf32>
    %17 = vector.broadcast %16 : vector<1x256xf32> to vector<160x256xf32>
    %18 = arith.mulf %15, %17 : vector<160x256xf32>
    %cst_8 = arith.constant dense<0.000000e+00> : vector<160xf32>
    %19 = vector.multi_reduction <add>, %18, %cst_8 [1] : vector<160x256xf32> to vector<160xf32>
    %20 = vector.shape_cast %19 : vector<160xf32> to vector<160x1xf32>
    %c0_9 = arith.constant 0 : index
    %c0_10 = arith.constant 0 : index
    %21 = vector.load %arg5[%c0_9, %c0_10] : memref<1x1xf32, #tpu.memory_space<vmem>>, vector<1x1xf32>
    %22 = vector.broadcast %21 : vector<1x1xf32> to vector<160x1xf32>
    %23 = arith.addf %20, %22 : vector<160x1xf32>
    %c0_11 = arith.constant 0 : index
    %c0_12 = arith.constant 0 : index
    %24 = vector.load %arg6[%c0_11, %c0_12] : memref<160x1xf32, #tpu.memory_space<vmem>>, vector<160x1xf32>
    tpu.vector_store %arg6[%c0_11, %c0_12], %23 {strides = array<i32>} : memref<160x1xf32, #tpu.memory_space<vmem>>, vector<160x1xf32>,
    return
  }
  func.func @transform_0(%arg0: i32) -> (i32, i32) {
    %c0_i32 = arith.constant 0 : i32
    %c0_i32_0 = arith.constant 0 : i32
    return %arg0, %c0_i32 : i32, i32
  }
  func.func @transform_1(%arg0: i32) -> (i32, i32) {
    %c0_i32 = arith.constant 0 : i32
    %c0_i32_0 = arith.constant 0 : i32
    %c0_i32_1 = arith.constant 0 : i32
    return %c0_i32, %c0_i32_0 : i32, i32
  }
  func.func @transform_2(%arg0: i32) -> (i32, i32) {
    %c0_i32 = arith.constant 0 : i32
    %c0_i32_0 = arith.constant 0 : i32
    %c0_i32_1 = arith.constant 0 : i32
    return %c0_i32, %c0_i32_0 : i32, i32
  }
  func.func @transform_3(%arg0: i32) -> (i32, i32) {
    %c0_i32 = arith.constant 0 : i32
    %c0_i32_0 = arith.constant 0 : i32
    %c0_i32_1 = arith.constant 0 : i32
    return %c0_i32, %c0_i32_0 : i32, i32
  }
  func.func @transform_4(%arg0: i32) -> (i32, i32) {
    %c0_i32 = arith.constant 0 : i32
    %c0_i32_0 = arith.constant 0 : i32
    %c0_i32_1 = arith.constant 0 : i32
    return %c0_i32, %c0_i32_0 : i32, i32
  }
  func.func @transform_5(%arg0: i32) -> (i32, i32) {
    %c0_i32 = arith.constant 0 : i32
    %c0_i32_0 = arith.constant 0 : i32
    return %arg0, %c0_i32 : i32, i32
  }
}

</mosaic_0001>

<bundles_post_ra>
// kernel: tpu_custom_call.1
= control target key start
LH: loop header
LB: loop body
LE: loop exit
PB: predicated region body
PF: predicated region fallthrough
CT: control target
= control target key end

     0   :  { %s6478_s0 = inlined_call_operand.hbm [shape: f32[300,1024], index: 0, kind: input, shape index: {}]   ;;  %s6479_s1 = inlined_call_operand.hbm [shape: bf16[1024,512], index: 1, kind: input, shape index: {}]   ;;  %s6480_s2 = inlined_call_operand.hbm [shape: f32[1,512], index: 2, kind: input, shape index: {}]   ;;  %s6481_s3 = inlined_call_operand.hbm [shape: f32[1,256], index: 3, kind: input, shape index: {}]   ;;  %s6482_s4 = inlined_call_operand.<no memory space> [shape: f32[1,1], index: 4, kind: input, shape index: {}]   ;;  %s6483_s5 = inlined_call_operand.vmem [shape: f32[300,1], index: 5, kind: output, shape index: {}]  }
   0x1   :  { %v10_v0 = vstv %s6482_s4 }
   0x2   :  { %11 = vst [vmem:[#allocation2] sm:$0x1] %v10_v0 }
   0x3   :  { %12 = vsyncpa [#allocation4], 0 }
   0x4   :  { %14 = vsyncpa [#allocation4 + $0x1], 0 }
   0x5   :  { %15 = vsyncpa [#allocation6], 0 }
   0x6   :  { %16 = vsyncpa [#allocation9], 0  ;;  %s5651_s20 = smov 0   ;;  %s5653_s21 = smov 0  }
   0x7   :  { %s5655_s22 = smov 0   ;;  %s5657_s23 = smov 0  }
   0x8 LB: > { %s5670_s4 = sadd.s32 4294967295, %s5576_s23   ;;  %s5673_s24 = sadd.s32 1, %s5576_s23   ;;  %s5576_s23 = sphi %s5657_s23, %s6507_s23   ;;  %s5572_s22 = sphi %s5655_s22, %s6506_s22   ;;  %s5568_s21 = sphi %s5653_s21, %s6505_s21   ;;  %s5564_s20 = sphi %s5651_s20, %s6504_s20  }
   0x9   : > { %s26_s25 = ssub.s32 %s5576_s23, %s5673_s24  ;;  %s29_s26 = sadd.s32 1, %s5572_s22 }
   0xa   : > { %p27_p0 = scmp.eq.s32.totalorder %s26_s25, 0  ;;  %p36_p1 = scmp.ne.s32.totalorder %s5572_s22, %s5568_s21 }
   0xb   : > { %p37_p2 = scmp.eq.s32.totalorder %s5576_s23, 0  ;;  %p42_p3 = scmp.ne.s32.totalorder %s5568_s21, %s5564_s20 }
   0xc   : > { %s5683_s27 = scalar_select %p27_p0, %s5572_s22, %s29_s26  }
   0xd   : > { %p5685_p4 = por %p37_p2, %p36_p1  ;;  %p6484_p5 = scmp.eq.s32.totalorder %s5670_s4, 0 }
   0xe   : > { %p150_p6 = scmp.eq.s32.totalorder %s5670_s4, 1  ;;  %p3976_p7 = scmp.ge.s32.totalorder %s5576_s23, 1 }
   0xf   : > { %s6487_s28 = scalar_select %p5685_p4, 1, 0 }
  0x10   : > { %p5694_p8 = por %p6484_p5, %p42_p3  ;;  %p163_p9 = scmp.lt.s32.totalorder %s5576_s23, 3 }
  0x11   : > { %p5699_p10 = por %p150_p6, %p36_p1  ;;  %s5610_s7 = smov [#allocation5]  }
  0x12   : > { %s6488_s29 = scalar_select %p5694_p8, 1, 0 }
  0x13   : > { %s6489_s30 = scalar_select %p5699_p10, 1, 0 }
  0x14   : > { %p5703_p11 = pnand %p3976_p7, %p163_p9  ;;  %s175_s8 = sshll.u32 %s5610_s7, 4  ;;  %s5709_s8 = int_to_ptr.vmem [resolvable:$true] %s175_s8 }
  0x15   : > { %s5611_s10 = smov [#allocation7]   ;;  %s5612_s12 = smov [#allocation8]  }
  0x16   : > { %s6490_s6 = scalar_select %p5703_p11, 1, 0 }
  0x17   : > { %p4642_p12 = pneg %p5703_p11  ;;  %s189_s11 = sshll.u32 %s5611_s10, 4  ;;  %s5717_s11 = int_to_ptr.vmem [resolvable:$true] %s189_s11 }
  0x18   : > { %s5719_s13 = sshll.u32 %s5612_s12, 4  ;;  %s5390_s16 = scalar_lea.hbm %s6479_s1, 32768  ;;  %s201_s13 = int_to_ptr.vmem [resolvable:$true] %s5719_s13 }
  0x19   : > { %p5713_p13 = pnand %p4642_p12, %p6484_p5  ;;  %p5391_p0 = scmp.ne.s32.totalorder %s6479_s1, %s5390_s16 }
  0x1a   : > { %p5397_p6 = scmp.lt.u32.totalorder %s5390_s16, %s6479_s1 }
  0x1b   : > { %p5729_p1 = pneg %p5713_p13 }
  0x1d   : > { %p5393_p2 = pnand %p5729_p1, %p5391_p0 }
  0x1f   : > { %p5394_p3 = pneg %p5393_p2 }
  0x21   : > { %p5399_p7 = pnand %p5397_p6, %p5394_p3 }
  0x23   : > { %5402 = shalt.err (!%p5399_p7)
}
  0x24   : > { %s5403_s26 = scalar_lea.vmem %s5709_s8, 32768  ;;  %p5411_p10 = scmp.lt.s32.totalorder %s5709_s8, %s5709_s8 }
  0x25   : > { %p5404_p9 = scmp.ne.s32.totalorder %s5709_s8, %s5403_s26  ;;  %p5412_p8 = scmp.lt.s32.totalorder %s5403_s26, %s5403_s26 }
  0x27   : > { %p5406_p12 = pnand %p5404_p9, %p5729_p1  ;;  %p5413_p0 = por %p5412_p8, %p5411_p10 }
  0x29   : > { %p5407_p5 = pneg %p5406_p12 }
  0x2b   : > { %p5414_p2 = pnand %p5413_p0, %p5407_p5 }
  0x2d   : > { %5417 = shalt.err (!%p5414_p2)
}
  0x2e   : > { %s5613_s7 = smov 256   ;;  %s5614_s10 = smov 16  }
  0x2f   : > { %4645 = dma.hbm_to_vmem [thread:$0]  (!%p5713_p13), %s6479_s1, 32768, %s5709_s8, [#allocation6], %s5613_s7, %s5613_s7, %s5614_s10  }
  0x30   : > { %s5418_s17 = scalar_lea.hbm %s6480_s2, 64 }
  0x31   : > { %p5419_p8 = scmp.ne.s32.totalorder %s6480_s2, %s5418_s17  ;;  %p5425_p3 = scmp.lt.u32.totalorder %s5418_s17, %s6480_s2 }
  0x33   : > { %p5421_p5 = pnand %p5419_p8, %p5729_p1 }
  0x35   : > { %p5422_p10 = pneg %p5421_p5 }
  0x37   : > { %p5427_p6 = pnand %p5425_p3, %p5422_p10 }
  0x39   : > { %5430 = shalt.err (!%p5427_p6)
}
  0x3a   : > { %s5431_s8 = scalar_lea.vmem %s5717_s11, 64  ;;  %p5439_p0 = scmp.lt.s32.totalorder %s5717_s11, %s5717_s11 }
  0x3b   : > { %p5432_p7 = scmp.ne.s32.totalorder %s5717_s11, %s5431_s8  ;;  %p5440_p2 = scmp.lt.s32.totalorder %s5431_s8, %s5431_s8 }
  0x3d   : > { %p5434_p9 = pnand %p5432_p7, %p5729_p1  ;;  %p5441_p8 = por %p5440_p2, %p5439_p0 }
  0x3f   : > { %p5435_p12 = pneg %p5434_p9 }
  0x41   : > { %p5442_p5 = pnand %p5441_p8, %p5435_p12 }
  0x43   : > { %5445 = shalt.err (!%p5442_p5)
}
  0x44   : > { %4648 = dma.hbm_to_vmem [thread:$0]  (!%p5713_p13), %s6480_s2, 64, %s5717_s11, [#allocation6]  }
  0x45   : > { %s5446_s15 = scalar_lea.hbm %s6481_s3, 32 }
  0x46   : > { %p5447_p10 = scmp.ne.s32.totalorder %s6481_s3, %s5446_s15  ;;  %p5453_p7 = scmp.lt.u32.totalorder %s5446_s15, %s6481_s3 }
  0x48   : > { %p5449_p3 = pnand %p5447_p10, %p5729_p1 }
  0x4a   : > { %p5450_p6 = pneg %p5449_p3 }
  0x4c   : > { %p5455_p9 = pnand %p5453_p7, %p5450_p6 }
  0x4e   : > { %5458 = shalt.err (!%p5455_p9)
}
  0x4f   : > { %s5459_s25 = scalar_lea.vmem %s201_s13, 32  ;;  %p5467_p8 = scmp.lt.s32.totalorder %s201_s13, %s201_s13 }
  0x50   : > { %p5460_p12 = scmp.ne.s32.totalorder %s201_s13, %s5459_s25  ;;  %p5468_p5 = scmp.lt.s32.totalorder %s5459_s25, %s5459_s25 }
  0x52   : > { %p5462_p0 = pnand %p5460_p12, %p5729_p1  ;;  %p5469_p11 = por %p5468_p5, %p5467_p8 }
  0x54   : > { %p5463_p2 = pneg %p5462_p0 }
  0x56   : > { %p5470_p4 = pnand %p5469_p11, %p5463_p2 }
  0x58   : > { %5473 = shalt.err (!%p5470_p4)
}
  0x59   : > { %4651 = dma.hbm_to_vmem [thread:$0]  (!%p5713_p13), %s6481_s3, 32, %s201_s13, [#allocation9]  }
  0x5a   : > { %p3980_p10 = scmp.ge.s32.totalorder %s5576_s23, 2 }
  0x5b   : > { %p6493_p3 = scmp.ne.s32.totalorder (!%p3980_p10), %s6487_s28, 0 }
  0x5c   : > { %210 = sbr.rel (%p3980_p10) target bundleno = 134 (0x86), region = 32 }
  0x63   : > { %213 = sbr.rel (!%p6493_p3) target bundleno = 134 (0x86), region = 36  ;;  %s214_s19 = sand.u32 (%p6493_p3), 1, %s5572_s22  }
  0x64   : > { %s219_s8 = smul.u32 (%p6493_p3), 20, %s5576_s23  ;;  %s5800_s14 = scalar_lea.sflag (%p6493_p3), [#allocation4], %s214_s19 }
  0x65   : > { %s4626_s7 = smul.u32 (%p6493_p3), 1280, %s214_s19 }
  0x66   : > { %s220_s10 = ssub.s32 (%p6493_p3), 38, %s219_s8 }
  0x67   : > { %p221_p11 = scmp.lt.s32.totalorder (%p6493_p3), %s220_s10, 20  ;;  %s218_s13 = scalar_lea.vmem (%p6493_p3), [#allocation3], %s4626_s7 }
  0x6a   : > { %s6509_s10 = smov (!%p221_p11, %s220_s10), 20 }
  0x6b   : > { %s5797_s12 = sshll.u32 %s6509_s10, 10 }
  0x6c   : > { %s226_s9 = ssub.s32 20480, %s5797_s12 }
  0x6d   : > { %227 = vsyncadd %s5800_s14, %s226_s9  ;;  %p3983_p4 = scmp.ne.s32.totalorder %s5797_s12, 0  ;;  %s4305_s28 = smul.u32 20480, %s5576_s23 }
  0x6e   : > { %s233_s15 = sshll.u32 %s218_s13, 4  ;;  %s5478_s23 = scalar_lea.hbm %s6478_s0, 38912  ;;  %s5810_s15 = int_to_ptr.vmem [resolvable:$true] %s233_s15 }
  0x6f   : > { %s5808_s18 = scalar_lea.hbm %s6478_s0, %s4305_s28 }
  0x70   : > { %s5474_s20 = scalar_lea.hbm %s5808_s18, %s5797_s12  ;;  %p5479_p7 = scmp.lt.u32.totalorder %s5808_s18, %s6478_s0 }
  0x71   : > { %p5475_p13 = scmp.ne.s32.totalorder %s5808_s18, %s5474_s20  ;;  %p5480_p9 = scmp.lt.u32.totalorder %s5478_s23, %s5474_s20 }
  0x72   : > { %p5482_p0 = scmp.lt.u32.totalorder %s5474_s20, %s5808_s18 }
  0x73   : > { %p5476_p1 = pnand %p5475_p13, %p3983_p4  ;;  %p5481_p12 = por %p5480_p9, %p5479_p7 }
  0x75   : > { %p5477_p6 = pneg %p5476_p1  ;;  %p5483_p2 = por %p5482_p0, %p5481_p12 }
  0x77   : > { %p5484_p8 = pnand %p5483_p2, %p5477_p6 }
  0x79   : > { %5487 = shalt.err (!%p5484_p8)
}
  0x7a   : > { %s5488_s8 = scalar_lea.vmem %s5810_s15, %s5797_s12  ;;  %s5615_s7 = smov [#allocation3]  }
  0x7b   : > { %p5489_p5 = scmp.ne.s32.totalorder %s5810_s15, %s5488_s8  ;;  %s5492_s10 = sshll.u32 %s5615_s7, 4  ;;  %s5493_s10 = int_to_ptr.vmem [resolvable:$false] %s5492_s10 }
  0x7c   : > { %s5494_s9 = scalar_lea.vmem %s5493_s10, 40960  ;;  %p5495_p11 = scmp.lt.s32.totalorder %s5810_s15, %s5493_s10 }
  0x7d   : > { %p5490_p10 = pnand %p5489_p5, %p3983_p4  ;;  %p5496_p13 = scmp.lt.s32.totalorder %s5494_s9, %s5488_s8 }
  0x7f   : > { %p5491_p3 = pneg %p5490_p10  ;;  %p5497_p1 = por %p5496_p13, %p5495_p11 }
  0x81   : > { %p5498_p7 = pnand %p5497_p1, %p5491_p3 }
  0x83   : > { %5501 = shalt.err (!%p5498_p7)
}
  0x84   : > { %s5616_s13 = smov 1024   ;;  %s5617_s28 = smov 64  }
  0x85   : > { %239 = dma.hbm_to_vmem [thread:$0]  (%p3983_p4), %s5808_s18, %s5797_s12, %s5810_s15, %s5800_s14, %s5616_s13, %s5616_s13, %s5617_s28  }
  0x86 PF: > { %p6494_p6 = scmp.ne.s32.totalorder %s6490_s6, 0 }
  0x87   : > { %s5840_s16 = sand.u32 (!%p6494_p6), 1, %s5568_s21   ;;  %p6495_p9 = scmp.ne.s32.totalorder (!%p6494_p6), %s6488_s29, 0 }
  0x88   : > { %245 = sbr.rel (%p6494_p6) target bundleno = 1024 (0x400), region = 40  ;;  %s248_s20 = scalar_lea.sflag (!%p6494_p6), [#allocation4], %s5840_s16 }
  0x89   : > { %s4627_s17 = smul.u32 (!%p6494_p6), 1280, %s5840_s16 }
  0x8b   : > { %s5844_s25 = scalar_lea.vmem (!%p6494_p6), [#allocation3], %s4627_s17 }
  0x8f   : > { %5551 = dma.done.wait (%p6495_p9), %s248_s20, 20480  }
  0x90   : > { %5553 = vsyncadd (%p6495_p9), %s248_s20, 4294946816  ;;  %p6496_p4 = scmp.eq.s32.totalorder %s5670_s4, 0 }
  0x92   : > { %5555 = dma.done.wait (%p6496_p4), [#allocation6], 32832   ;;  %p6497_p12 = pmov %p6496_p4 }
  0x93   : > { %p6498_p0 = pmov %p6496_p4 }
  0x94   : > { %5557 = vsyncadd (%p6497_p12), [#allocation6], 4294934464 }
  0x95   : > { %5559 = dma.done.wait (%p6498_p0), [#allocation9], 32   ;;  %p6499_p2 = pmov %p6498_p0 }
  0x96   : > { %v4762_v1 = vld [vmem:[#allocation5 + $0x4] ss:$16 sps:$4 sm:$0xff]   ;;  %v4764_v2 = vld [vmem:[#allocation5 + $0xc] ss:$16 sps:$4 sm:$0xff]   ;;  %v4766_v3 = vld [vmem:[#allocation5] ss:$16 sps:$4 sm:$0xff]  }
  0x97   : > { %5561 = vsyncadd (%p6499_p2), [#allocation9], 4294967264  ;;  %2098 = vmatprep.subr.bf16.mxu0 %v4762_v1  ;;  %v4767_v4 = vld [vmem:[#allocation5 + $0x8] ss:$16 sps:$4 sm:$0xff]   ;;  %2630 = vmatprep.subr.bf16.mxu1 %v4764_v2  ;;  %v4768_v5 = vld [vmem:[#allocation5 + $0x24] ss:$16 sps:$4 sm:$0xff]  }
  0x98   : > { %2099 = vmatpush1.bf16.msra.mxu0 %v4766_v3  ;;  %2631 = vmatpush1.bf16.msra.mxu1 %v4767_v4  ;;  %v4770_v6 = vld [vmem:[#allocation5 + $0x2c] ss:$16 sps:$4 sm:$0xff]   ;;  %v4772_v7 = vld [vmem:[#allocation5 + $0x20] ss:$16 sps:$4 sm:$0xff]   ;;  %v4773_v8 = vld [vmem:[#allocation5 + $0x28] ss:$16 sps:$4 sm:$0xff]  }
  0x99   : > { %2100 = vmatprep.subr.bf16.mxu0 %v4768_v5  ;;  %2632 = vmatprep.subr.bf16.mxu1 %v4770_v6  ;;  %v4774_v9 = vld [vmem:[#allocation5 + $0x44] ss:$16 sps:$4 sm:$0xff]   ;;  %v4776_v10 = vld [vmem:[#allocation5 + $0x4c] ss:$16 sps:$4 sm:$0xff]   ;;  %v4778_v11 = vld [vmem:[#allocation5 + $0x40] ss:$16 sps:$4 sm:$0xff]  }
  0x9a   : > { %v4779_v12 = vld [vmem:[#allocation5 + $0x48] ss:$16 sps:$4 sm:$0xff]   ;;  %v4780_v13 = vld [vmem:[#allocation5 + $0x64] ss:$16 sps:$4 sm:$0xff]   ;;  %v4782_v14 = vld [vmem:[#allocation5 + $0x6c] ss:$16 sps:$4 sm:$0xff]  }
  0x9b   : > { %v4784_v15 = vld [vmem:[#allocation5 + $0x60] ss:$16 sps:$4 sm:$0xff]   ;;  %v4785_v16 = vld [vmem:[#allocation5 + $0x68] ss:$16 sps:$4 sm:$0xff]   ;;  %v4786_v17 = vld [vmem:[#allocation5 + $0x84] ss:$16 sps:$4 sm:$0xff]  }
  0x9c   : > { %2101 = vmatpush1.bf16.msra.mxu0 %v4772_v7  ;;  %2633 = vmatpush1.bf16.msra.mxu1 %v4773_v8  ;;  %v4788_v18 = vld [vmem:[#allocation5 + $0x8c] ss:$16 sps:$4 sm:$0xff]   ;;  %v4790_v19 = vld [vmem:[#allocation5 + $0x80] ss:$16 sps:$4 sm:$0xff]   ;;  %v4791_v20 = vld [vmem:[#allocation5 + $0x88] ss:$16 sps:$4 sm:$0xff]  }
  0x9d   : > { %2102 = vmatprep.subr.bf16.mxu0 %v4774_v9  ;;  %2634 = vmatprep.subr.bf16.mxu1 %v4776_v10  ;;  %v4792_v21 = vld [vmem:[#allocation5 + $0xa4] ss:$16 sps:$4 sm:$0xff]   ;;  %v4794_v22 = vld [vmem:[#allocation5 + $0xac] ss:$16 sps:$4 sm:$0xff]   ;;  %v4796_v23 = vld [vmem:[#allocation5 + $0xa0] ss:$16 sps:$4 sm:$0xff]  }
  0x9e   : > { %v4797_v24 = vld [vmem:[#allocation5 + $0xa8] ss:$16 sps:$4 sm:$0xff]   ;;  %v4798_v25 = vld [vmem:[#allocation5 + $0xc4] ss:$16 sps:$4 sm:$0xff]   ;;  %v4800_v26 = vld [vmem:[#allocation5 + $0xcc] ss:$16 sps:$4 sm:$0xff]  }
  0x9f   : > { %v4802_v27 = vld [vmem:[#allocation5 + $0xc0] ss:$16 sps:$4 sm:$0xff]   ;;  %v4803_v28 = vld [vmem:[#allocation5 + $0xc8] ss:$16 sps:$4 sm:$0xff]   ;;  %v4804_v29 = vld [vmem:[#allocation5 + $0xe4] ss:$16 sps:$4 sm:$0xff]  }
  0xa0   : > { %2103 = vmatpush1.bf16.msra.mxu0 %v4778_v11  ;;  %2635 = vmatpush1.bf16.msra.mxu1 %v4779_v12  ;;  %v4806_v30 = vld [vmem:[#allocation5 + $0xec] ss:$16 sps:$4 sm:$0xff]   ;;  %v4808_v31 = vld [vmem:[#allocation5 + $0xe0] ss:$16 sps:$4 sm:$0xff]   ;;  %v4809_v32 = vld [vmem:[#allocation5 + $0xe8] ss:$16 sps:$4 sm:$0xff]  }
  0xa1   : > { %2104 = vmatprep.subr.bf16.mxu0 %v4780_v13  ;;  %2636 = vmatprep.subr.bf16.mxu1 %v4782_v14  ;;  %v4810_v33 = vld [vmem:[#allocation5 + $0x104] ss:$16 sps:$4 sm:$0xff]   ;;  %v4812_v34 = vld [vmem:[#allocation5 + $0x10c] ss:$16 sps:$4 sm:$0xff]   ;;  %v4814_v35 = vld [vmem:[#allocation5 + $0x100] ss:$16 sps:$4 sm:$0xff]  }
  0xa2   : > { %v4815_v36 = vld [vmem:[#allocation5 + $0x108] ss:$16 sps:$4 sm:$0xff]   ;;  %v4816_v37 = vld [vmem:[#allocation5 + $0x124] ss:$16 sps:$4 sm:$0xff]   ;;  %v4818_v38 = vld [vmem:[#allocation5 + $0x12c] ss:$16 sps:$4 sm:$0xff]  }
  0xa3   : > { %v4820_v39 = vld [vmem:[#allocation5 + $0x120] ss:$16 sps:$4 sm:$0xff]   ;;  %v4821_v40 = vld [vmem:[#allocation5 + $0x128] ss:$16 sps:$4 sm:$0xff]   ;;  %v4822_v41 = vld [vmem:[#allocation5 + $0x144] ss:$16 sps:$4 sm:$0xff]  }
  0xa4   : > { %2105 = vmatpush1.bf16.msra.mxu0 %v4784_v15  ;;  %2637 = vmatpush1.bf16.msra.mxu1 %v4785_v16  ;;  %v4824_v42 = vld [vmem:[#allocation5 + $0x14c] ss:$16 sps:$4 sm:$0xff]   ;;  %v4826_v43 = vld [vmem:[#allocation5 + $0x140] ss:$16 sps:$4 sm:$0xff]   ;;  %v4827_v44 = vld [vmem:[#allocation5 + $0x148] ss:$16 sps:$4 sm:$0xff]  }
  0xa5   : > { %2106 = vmatprep.subr.bf16.mxu0 %v4786_v17  ;;  %2638 = vmatprep.subr.bf16.mxu1 %v4788_v18  ;;  %v4828_v45 = vld [vmem:[#allocation5 + $0x164] ss:$16 sps:$4 sm:$0xff]   ;;  %v4830_v46 = vld [vmem:[#allocation5 + $0x16c] ss:$16 sps:$4 sm:$0xff]   ;;  %v4832_v48 = vld [vmem:[#allocation5 + $0x160] ss:$16 sps:$4 sm:$0xff]  }
  0xa6   : > { %v301_v47 = vld [vmem:[%s5844_s25 + $0x8] sm:$0xff]  ;;  %v4834_v51 = vld [vmem:[#allocation5 + $0x184] ss:$16 sps:$4 sm:$0xff]   ;;  %v4838_v54 = vld [vmem:[#allocation5 + $0x180] ss:$16 sps:$4 sm:$0xff]   ;;  %s4628_s29 = smul.u32 160, %s5840_s16 }
  0xa7   : > { %v4833_v49 = vld [vmem:[#allocation5 + $0x168] ss:$16 sps:$4 sm:$0xff]   ;;  %v4836_v53 = vld [vmem:[#allocation5 + $0x18c] ss:$16 sps:$4 sm:$0xff]   ;;  %v4840_v56 = vld [vmem:[#allocation5 + $0x1a4] ss:$16 sps:$4 sm:$0xff]  }
  0xa8   : > { %2107 = vmatpush1.bf16.msra.mxu0 %v4790_v19  ;;  %2639 = vmatpush1.bf16.msra.mxu1 %v4791_v20  ;;  %v309_v50 = vld [vmem:[%s5844_s25 + $0x48] sm:$0xff]  ;;  %v4844_v58 = vld [vmem:[#allocation5 + $0x1a0] ss:$16 sps:$4 sm:$0xff]   ;;  %v4846_v60 = vld [vmem:[#allocation5 + $0x1c4] ss:$16 sps:$4 sm:$0xff]   ;;  %vm3621_vm0 = vcmask 7168  }
  0xa9   : > { %2108 = vmatprep.subr.bf16.mxu0 %v4792_v21  ;;  %2640 = vmatprep.subr.bf16.mxu1 %v4794_v22  ;;  %v461_v52 = vpack.c.bf16 %v309_v50, %v301_v47  ;;  %v4839_v55 = vld [vmem:[#allocation5 + $0x188] ss:$16 sps:$4 sm:$0xff]   ;;  %v4842_v57 = vld [vmem:[#allocation5 + $0x1ac] ss:$16 sps:$4 sm:$0xff]   ;;  %v4850_v62 = vld [vmem:[#allocation5 + $0x1c0] ss:$16 sps:$4 sm:$0xff]  }
  0xaa   : > { %v4845_v59 = vld [vmem:[#allocation5 + $0x1a8] ss:$16 sps:$4 sm:$0xff]   ;;  %v4848_v61 = vld [vmem:[#allocation5 + $0x1cc] ss:$16 sps:$4 sm:$0xff]   ;;  %v4852_v0 = vld [vmem:[#allocation5 + $0x1e4] ss:$16 sps:$4 sm:$0xff]  }
  0xab   : > { %2130 = vmatprep.mubr.bf16.mxu0 %v461_v52  ;;  %2662 = vmatprep.mubr.bf16.mxu1 %v461_v52  ;;  %v4851_v63 = vld [vmem:[#allocation5 + $0x1c8] ss:$16 sps:$4 sm:$0xff]   ;;  %v4854_v1 = vld [vmem:[#allocation5 + $0x1ec] ss:$16 sps:$4 sm:$0xff]   ;;  %v4856_v2 = vld [vmem:[#allocation5 + $0x1e0] ss:$16 sps:$4 sm:$0xff]  }
  0xac   : > { %2109 = vmatpush1.bf16.msra.mxu0 %v4796_v23  ;;  %2641 = vmatpush1.bf16.msra.mxu1 %v4797_v24  ;;  %v4857_v3 = vld [vmem:[#allocation5 + $0x1e8] ss:$16 sps:$4 sm:$0xff]   ;;  %v300_v4 = vld [vmem:[%s5844_s25] sm:$0xff]  ;;  %v4860_v6 = vld [vmem:[#allocation5 + $0x20c] ss:$16 sps:$4 sm:$0xff]   ;;  %s6330_s6 = scalar_lea.vmem [#allocation10], %s4628_s29  }
  0xad   : > { %2110 = vmatprep.subr.bf16.mxu0 %v4798_v25  ;;  %2642 = vmatprep.subr.bf16.mxu1 %v4800_v26  ;;  %v308_v5 = vld [vmem:[%s5844_s25 + $0x40] sm:$0xff]  ;;  %v317_v7 = vld [vmem:[%s5844_s25 + $0x88] sm:$0xff]  ;;  %p6500_p8 = scmp.ne.s32.totalorder %s6489_s30, 0 }
  0xae   : > { %v325_v8 = vld [vmem:[%s5844_s25 + $0xc8] sm:$0xff]  ;;  %v4869_v9 = vld [vmem:[#allocation5 + $0x204] ss:$16 sps:$4 sm:$0xff]   ;;  %v460_v10 = vpack.c.bf16 %v308_v5, %v300_v4  ;;  %v4867_v15 = vld [vmem:[#allocation5 + $0x200] ss:$16 sps:$4 sm:$0xff]   ;;  %s3649_s12 = smul.u32 (%p6500_p8), 20, %s5670_s4 }
  0xaf   : > { %v4858_v11 = vld [vmem:[#allocation5 + $0x208] ss:$16 sps:$4 sm:$0xff]   ;;  %v469_v12 = vpack.c.bf16 %v325_v8, %v317_v7  ;;  %v4863_v13 = vld [vmem:[#allocation5 + $0x22c] ss:$16 sps:$4 sm:$0xff]   ;;  %v316_v16 = vld [vmem:[%s5844_s25 + $0x80] sm:$0xff]  ;;  %s4304_s14 = smul.u32 (%p6500_p8), 160, %s5670_s4 }
  0xb0   : > { %2111 = vmatpush1.bf16.msra.mxu0 %v4802_v27  ;;  %2643 = vmatpush1.bf16.msra.mxu1 %v4803_v28  ;;  %v4861_v14 = vld [vmem:[#allocation5 + $0x228] ss:$16 sps:$4 sm:$0xff]   ;;  %v4875_v17 = vld [vmem:[#allocation5 + $0x224] ss:$16 sps:$4 sm:$0xff]   ;;  %v4866_v19 = vld [vmem:[#allocation5 + $0x24c] ss:$16 sps:$4 sm:$0xff]  }
  0xb1   : > { %2112 = vmatprep.subr.bf16.mxu0 %v4804_v29  ;;  %2644 = vmatprep.subr.bf16.mxu1 %v4806_v30  ;;  %v324_v18 = vld [vmem:[%s5844_s25 + $0xc0] sm:$0xff]  ;;  %v333_v20 = vld [vmem:[%s5844_s25 + $0x108] sm:$0xff]  ;;  %s3650_s15 = ssub.s32 (%p6500_p8), 38, %s3649_s12  ;;  %s6379_s23 = scalar_lea.vmem (%p6500_p8), %s6483_s5, %s4304_s14  }
  0xb2   : > { %v341_v21 = vld [vmem:[%s5844_s25 + $0x148] sm:$0xff]  ;;  %v4873_v22 = vld [vmem:[#allocation5 + $0x220] ss:$16 sps:$4 sm:$0xff]   ;;  %v468_v23 = vpack.c.bf16 %v324_v18, %v316_v16  ;;  %v4881_v30 = vld [vmem:[#allocation5 + $0x244] ss:$16 sps:$4 sm:$0xff]   ;;  %p3651_p5 = scmp.lt.s32.totalorder (%p6500_p8), %s3650_s15, 20 }
  0xb3   : > { %v4864_v24 = vld [vmem:[#allocation5 + $0x248] ss:$16 sps:$4 sm:$0xff]   ;;  %v477_v25 = vpack.c.bf16 %v341_v21, %v333_v20  ;;  %v4872_v26 = vld [vmem:[#allocation5 + $0x26c] ss:$16 sps:$4 sm:$0xff]   ;;  %v332_v28 = vld [vmem:[%s5844_s25 + $0x100] sm:$0xff] }
  0xb4   : > { %2113 = vmatpush1.bf16.msra.mxu0 %v4808_v31  ;;  %2645 = vmatpush1.bf16.msra.mxu1 %v4809_v32  ;;  %v4870_v27 = vld [vmem:[#allocation5 + $0x268] ss:$16 sps:$4 sm:$0xff]   ;;  %v340_v29 = vld [vmem:[%s5844_s25 + $0x140] sm:$0xff]  ;;  %v4878_v31 = vld [vmem:[#allocation5 + $0x28c] ss:$16 sps:$4 sm:$0xff]  }
  0xb5   : > { %2114 = vmatprep.subr.bf16.mxu0 %v4810_v33  ;;  %2646 = vmatprep.subr.bf16.mxu1 %v4812_v34  ;;  %v349_v32 = vld [vmem:[%s5844_s25 + $0x188] sm:$0xff]  ;;  %v4879_v33 = vld [vmem:[#allocation5 + $0x240] ss:$16 sps:$4 sm:$0xff]   ;;  %v4887_v34 = vld [vmem:[#allocation5 + $0x264] ss:$16 sps:$4 sm:$0xff]  }
  0xb6   : > { %v373_v47 = vld [vmem:[%s5844_s25 + $0x248] sm:$0xff]  ;;  %v4899_v52 = vld [vmem:[#allocation5 + $0x2a4] ss:$16 sps:$4 sm:$0xff]   ;;  %v4906_v4 = vld [vmem:[#allocation5 + $0x2e0] ss:$16 sps:$4 sm:$0xff]  }
  0xb7   : > { %v4888_v50 = vld [vmem:[#allocation5 + $0x2c8] ss:$16 sps:$4 sm:$0xff]   ;;  %v4911_v5 = vld [vmem:[#allocation5 + $0x32c] ss:$16 sps:$4 sm:$0xff]   ;;  %v4914_v8 = vld [vmem:[#allocation5 + $0x304] ss:$16 sps:$4 sm:$0xff]  }
  0xb8   : > { %2115 = vmatpush1.bf16.msra.mxu0 %v4814_v35  ;;  %2647 = vmatpush1.bf16.msra.mxu1 %v4815_v36  ;;  %v357_v35 = vld [vmem:[%s5844_s25 + $0x1c8] sm:$0xff]  ;;  %v476_v36 = vpack.c.bf16 %v340_v29, %v332_v28  ;;  %v4918_v16 = vld [vmem:[#allocation5 + $0x320] ss:$16 sps:$4 sm:$0xff]   ;;  %v4926_v20 = vld [vmem:[#allocation5 + $0x344] ss:$16 sps:$4 sm:$0xff]  }
  0xb9   : > { %2116 = vmatprep.subr.bf16.mxu0 %v4816_v37  ;;  %2648 = vmatprep.subr.bf16.mxu1 %v4818_v38  ;;  %v4876_v37 = vld [vmem:[#allocation5 + $0x288] ss:$16 sps:$4 sm:$0xff]   ;;  %v485_v38 = vpack.c.bf16 %v357_v35, %v349_v32  ;;  %v396_v18 = vld [vmem:[%s5844_s25 + $0x300] sm:$0xff] }
  0xba   : > { %v4909_v7 = vld [vmem:[#allocation5 + $0x328] ss:$16 sps:$4 sm:$0xff]   ;;  %v404_v21 = vld [vmem:[%s5844_s25 + $0x340] sm:$0xff] }
  0xbb   : > { %v4929_v29 = vld [vmem:[#allocation5 + $0x364] ss:$16 sps:$4 sm:$0xff]   ;;  %v429_v35 = vld [vmem:[%s5844_s25 + $0x408] sm:$0xff] }
  0xbc   : > { %2117 = vmatpush1.bf16.msra.mxu0 %v4820_v39  ;;  %2649 = vmatpush1.bf16.msra.mxu1 %v4821_v40  ;;  %v4884_v39 = vld [vmem:[#allocation5 + $0x2ac] ss:$16 sps:$4 sm:$0xff]   ;;  %v348_v40 = vld [vmem:[%s5844_s25 + $0x180] sm:$0xff] }
  0xbd   : > { %2118 = vmatprep.subr.bf16.mxu0 %v4822_v41  ;;  %2650 = vmatprep.subr.bf16.mxu1 %v4824_v42  ;;  %v356_v41 = vld [vmem:[%s5844_s25 + $0x1c0] sm:$0xff]  ;;  %v4882_v42 = vld [vmem:[#allocation5 + $0x2a8] ss:$16 sps:$4 sm:$0xff]  }
  0xbe   : > { %v420_v32 = vld [vmem:[%s5844_s25 + $0x3c0] sm:$0xff] }
  0xc0   : > { %2119 = vmatpush1.bf16.msra.mxu0 %v4826_v43  ;;  %2651 = vmatpush1.bf16.msra.mxu1 %v4827_v44  ;;  %v4885_v43 = vld [vmem:[#allocation5 + $0x260] ss:$16 sps:$4 sm:$0xff]   ;;  %v4890_v44 = vld [vmem:[#allocation5 + $0x2cc] ss:$16 sps:$4 sm:$0xff]  }
  0xc1   : > { %2120 = vmatprep.subr.bf16.mxu0 %v4828_v45  ;;  %2652 = vmatprep.subr.bf16.mxu1 %v4830_v46  ;;  %v4893_v45 = vld [vmem:[#allocation5 + $0x284] ss:$16 sps:$4 sm:$0xff]   ;;  %v365_v46 = vld [vmem:[%s5844_s25 + $0x208] sm:$0xff] }
  0xc4   : > { %2121 = vmatpush1.bf16.msra.mxu0 %v4832_v48  ;;  %2653 = vmatpush1.bf16.msra.mxu1 %v4833_v49  ;;  %v4891_v48 = vld [vmem:[#allocation5 + $0x280] ss:$16 sps:$4 sm:$0xff]   ;;  %v484_v49 = vpack.c.bf16 %v356_v41, %v348_v40  ;;  %v4944_v40 = vld [vmem:[#allocation5 + $0x3cc] ss:$16 sps:$4 sm:$0xff]  }
  0xc5   : > { %2122 = vmatprep.subr.bf16.mxu0 %v4834_v51  ;;  %2654 = vmatprep.subr.bf16.mxu1 %v4836_v53  ;;  %v493_v51 = vpack.c.bf16 %v373_v47, %v365_v46  ;;  %v4896_v53 = vld [vmem:[#allocation5 + $0x2ec] ss:$16 sps:$4 sm:$0xff]   ;;  %v428_v47 = vld [vmem:[%s5844_s25 + $0x400] sm:$0xff] }
  0xc6   : > { %v4950_v46 = vld [vmem:[#allocation5 + $0x3ec] ss:$16 sps:$4 sm:$0xff]  }
  0xc8   : > { %2123 = vmatpush1.bf16.msra.mxu0 %v4838_v54  ;;  %2655 = vmatpush1.bf16.msra.mxu1 %v4839_v55  ;;  %v4897_v54 = vld [vmem:[#allocation5 + $0x2a0] ss:$16 sps:$4 sm:$0xff]  }
  0xc9   : > { %2124 = vmatprep.subr.bf16.mxu0 %v4840_v56  ;;  %2656 = vmatprep.subr.bf16.mxu1 %v4842_v57  ;;  %v364_v55 = vld [vmem:[%s5844_s25 + $0x200] sm:$0xff] }
  0xca   : > { %v4902_v56 = vld [vmem:[#allocation5 + $0x2c4] ss:$16 sps:$4 sm:$0xff]  }
  0xcb   : > { %v372_v57 = vld [vmem:[%s5844_s25 + $0x240] sm:$0xff] }
  0xcc   : > { %2125 = vmatpush1.bf16.msra.mxu0 %v4844_v58  ;;  %2657 = vmatpush1.bf16.msra.mxu1 %v4845_v59  ;;  %v4894_v58 = vld [vmem:[#allocation5 + $0x2e8] ss:$16 sps:$4 sm:$0xff]  }
  0xcd   : > { %2126 = vmatprep.subr.bf16.mxu0 %v4846_v60  ;;  %2658 = vmatprep.subr.bf16.mxu1 %v4848_v61  ;;  %v381_v59 = vld [vmem:[%s5844_s25 + $0x288] sm:$0xff]  ;;  %v4900_v61 = vld [vmem:[#allocation5 + $0x2c0] ss:$16 sps:$4 sm:$0xff]  }
  0xce   : > { %v389_v60 = vld [vmem:[%s5844_s25 + $0x2c8] sm:$0xff] }
  0xd0   : > { %2127 = vmatpush1.bf16.msra.mxu0 %v4850_v62  ;;  %2659 = vmatpush1.bf16.msra.mxu1 %v4851_v63  ;;  %v4905_v62 = vld [vmem:[#allocation5 + $0x30c] ss:$16 sps:$4 sm:$0xff]   ;;  %v492_v63 = vpack.c.bf16 %v372_v57, %v364_v55  ;;  %v4953_v57 = vld [vmem:[#allocation5 + $0x3e4] ss:$16 sps:$4 sm:$0xff]  }
  0xd1   : > { %2128 = vmatprep.subr.bf16.mxu0 %v4852_v0  ;;  %2660 = vmatprep.subr.bf16.mxu1 %v4854_v1  ;;  %v501_v0 = vpack.c.bf16 %v389_v60, %v381_v59  ;;  %v4903_v1 = vld [vmem:[#allocation5 + $0x308] ss:$16 sps:$4 sm:$0xff]   ;;  %v444_v59 = vld [vmem:[%s5844_s25 + $0x480] sm:$0xff] }
  0xd2   : > { %v452_v60 = vld [vmem:[%s5844_s25 + $0x4c0] sm:$0xff] }
  0xd4   : > { %2129 = vmatpush1.bf16.msra.mxu0 %v4856_v2  ;;  %2661 = vmatpush1.bf16.msra.mxu1 %v4857_v3  ;;  %v4908_v2 = vld [vmem:[#allocation5 + $0x2e4] ss:$16 sps:$4 sm:$0xff]  }
  0xd5   : > { %2763 = vmatprep.subr.bf16.mxu1 %v4860_v6  ;;  %2231 = vmatprep.subr.bf16.mxu0 %v4869_v9  ;;  %v380_v3 = vld [vmem:[%s5844_s25 + $0x280] sm:$0xff]  ;;  %v397_v9 = vld [vmem:[%s5844_s25 + $0x308] sm:$0xff] }
  0xd6   : > { %v388_v6 = vld [vmem:[%s5844_s25 + $0x2c0] sm:$0xff] }
  0xd7   : > { %2131 = vmatmul.mubr.bf16.vlgmr.msra.gmra.mrb[0].mxu0 %v460_v10  ;;  %2663 = vmatmul.mubr.bf16.vlgmr.msra.gmra.mrb[0].mxu1 %v460_v10  ;;  %v405_v10 = vld [vmem:[%s5844_s25 + $0x348] sm:$0xff] }
  0xd8   : > { %2764 = vmatpush1.bf16.msra.mxu1 %v4858_v11  ;;  %2140 = vmatprep.mubr.bf16.mxu0 %v469_v12  ;;  %v4912_v11 = vld [vmem:[#allocation5 + $0x300] ss:$16 sps:$4 sm:$0xff]  }
  0xd9   : > { %2765 = vmatprep.subr.bf16.mxu1 %v4863_v13  ;;  %2672 = vmatprep.mubr.bf16.mxu1 %v469_v12  ;;  %v4917_v12 = vld [vmem:[#allocation5 + $0x34c] ss:$16 sps:$4 sm:$0xff]   ;;  %v500_v13 = vpack.c.bf16 %v388_v6, %v380_v3  ;;  %v310_v3 = vld [vmem:[%s5844_s25 + $0x50] sm:$0xff] }
  0xda   : > { %2232 = vmatpush1.bf16.msra.mxu0 %v4867_v15  ;;  %v4915_v15 = vld [vmem:[#allocation5 + $0x348] ss:$16 sps:$4 sm:$0xff]  }
  0xdb   : > { %2233 = vmatprep.subr.bf16.mxu0 %v4875_v17  ;;  %v4920_v17 = vld [vmem:[#allocation5 + $0x324] ss:$16 sps:$4 sm:$0xff]  }
  0xdc   : > { %2766 = vmatpush1.bf16.msra.mxu1 %v4861_v14  ;;  %v509_v14 = vpack.c.bf16 %v405_v10, %v397_v9  ;;  %v4959_v9 = vld [vmem:[#allocation5 + $0x42c] ss:$16 sps:$4 sm:$0xff]   ;;  %v4957_v10 = vld [vmem:[#allocation5 + $0x428] ss:$16 sps:$4 sm:$0xff]  }
  0xdd   : > { %2767 = vmatprep.subr.bf16.mxu1 %v4866_v19  ;;  %v4923_v19 = vld [vmem:[#allocation5 + $0x36c] ss:$16 sps:$4 sm:$0xff]  }
  0xde   : > { %2234 = vmatpush1.bf16.msra.mxu0 %v4873_v22  ;;  %v413_v22 = vld [vmem:[%s5844_s25 + $0x388] sm:$0xff] }
  0xdf   : > { %2141 = vmatmul.mubr.bf16.gmra.mrb[4].mxu0 %v468_v23  ;;  %2673 = vmatmul.mubr.bf16.gmra.mrb[4].mxu1 %v468_v23  ;;  %v421_v23 = vld [vmem:[%s5844_s25 + $0x3c8] sm:$0xff] }
  0xe0   : > { %2768 = vmatpush1.bf16.msra.mxu1 %v4864_v24  ;;  %2150 = vmatprep.mubr.bf16.mxu0 %v477_v25  ;;  %v4921_v24 = vld [vmem:[#allocation5 + $0x368] ss:$16 sps:$4 sm:$0xff]   ;;  %v517_v28 = vpack.c.bf16 %v421_v23, %v413_v22  ;;  %v4968_v22 = vld [vmem:[#allocation5 + $0x46c] ss:$16 sps:$4 sm:$0xff]  }
  0xe1   : > { %2682 = vmatprep.mubr.bf16.mxu1 %v477_v25  ;;  %2769 = vmatprep.subr.bf16.mxu1 %v4872_v26  ;;  %v4924_v25 = vld [vmem:[#allocation5 + $0x340] ss:$16 sps:$4 sm:$0xff]   ;;  %v4932_v26 = vld [vmem:[#allocation5 + $0x38c] ss:$16 sps:$4 sm:$0xff]   ;;  %v4966_v23 = vld [vmem:[#allocation5 + $0x468] ss:$16 sps:$4 sm:$0xff]  }
  0xe2   : > { %2235 = vmatprep.subr.bf16.mxu0 %v4881_v30  ;;  %v4930_v30 = vld [vmem:[#allocation5 + $0x388] ss:$16 sps:$4 sm:$0xff]  }
  0xe3   : > { %2236 = vmatpush1.bf16.msra.mxu0 %v4879_v33  ;;  %v4927_v33 = vld [vmem:[#allocation5 + $0x360] ss:$16 sps:$4 sm:$0xff]  }
  0xe4   : > { %2770 = vmatpush1.bf16.msra.mxu1 %v4870_v27  ;;  %2237 = vmatprep.subr.bf16.mxu0 %v4887_v34  ;;  %v508_v27 = vpack.c.bf16 %v404_v21, %v396_v18  ;;  %v4938_v34 = vld [vmem:[#allocation5 + $0x3ac] ss:$16 sps:$4 sm:$0xff]   ;;  %v4969_v18 = vld [vmem:[#allocation5 + $0x420] ss:$16 sps:$4 sm:$0xff]  }
  0xe5   : > { %2771 = vmatprep.subr.bf16.mxu1 %v4878_v31  ;;  %v412_v31 = vld [vmem:[%s5844_s25 + $0x380] sm:$0xff] }
  0xe6   : > { %v516_v41 = vpack.c.bf16 %v420_v32, %v412_v31  ;;  %v359_v31 = vld [vmem:[%s5844_s25 + $0x1d8] sm:$0xff] }
  0xe7   : > { %2151 = vmatmul.mubr.bf16.gmra.mrb[8].mxu0 %v476_v36  ;;  %2683 = vmatmul.mubr.bf16.gmra.mrb[8].mxu1 %v476_v36  ;;  %v4935_v36 = vld [vmem:[#allocation5 + $0x384] ss:$16 sps:$4 sm:$0xff]  }
  0xe8   : > { %2772 = vmatpush1.bf16.msra.mxu1 %v4876_v37  ;;  %2160 = vmatprep.mubr.bf16.mxu0 %v485_v38  ;;  %v437_v37 = vld [vmem:[%s5844_s25 + $0x448] sm:$0xff] }
  0xe9   : > { %2692 = vmatprep.mubr.bf16.mxu1 %v485_v38  ;;  %2773 = vmatprep.subr.bf16.mxu1 %v4884_v39  ;;  %v4936_v38 = vld [vmem:[#allocation5 + $0x3a8] ss:$16 sps:$4 sm:$0xff]   ;;  %v4933_v39 = vld [vmem:[#allocation5 + $0x380] ss:$16 sps:$4 sm:$0xff]  }
  0xea   : > { %2238 = vmatpush1.bf16.msra.mxu0 %v4885_v43  ;;  %v4941_v43 = vld [vmem:[#allocation5 + $0x3a4] ss:$16 sps:$4 sm:$0xff]  }
  0xeb   : > { %2239 = vmatprep.subr.bf16.mxu0 %v4893_v45  ;;  %v4939_v45 = vld [vmem:[#allocation5 + $0x3a0] ss:$16 sps:$4 sm:$0xff]  }
  0xec   : > { %2774 = vmatpush1.bf16.msra.mxu1 %v4882_v42  ;;  %v525_v42 = vpack.c.bf16 %v437_v37, %v429_v35  ;;  %v4980_v35 = vld [vmem:[#allocation5 + $0x4ac] ss:$16 sps:$4 sm:$0xff]   ;;  %v358_v37 = vld [vmem:[%s5844_s25 + $0x1d0] sm:$0xff] }
  0xed   : > { %2775 = vmatprep.subr.bf16.mxu1 %v4890_v44  ;;  %v4942_v44 = vld [vmem:[#allocation5 + $0x3c8] ss:$16 sps:$4 sm:$0xff]  }
  0xee   : > { %2240 = vmatpush1.bf16.msra.mxu0 %v4891_v48  ;;  %v4947_v48 = vld [vmem:[#allocation5 + $0x3c4] ss:$16 sps:$4 sm:$0xff]  }
  0xef   : > { %2161 = vmatmul.mubr.bf16.gmra.mrb[12].mxu0 %v484_v49  ;;  %2693 = vmatmul.mubr.bf16.gmra.mrb[12].mxu1 %v484_v49  ;;  %v436_v49 = vld [vmem:[%s5844_s25 + $0x440] sm:$0xff] }
  0xf0   : > { %2170 = vmatprep.mubr.bf16.mxu0 %v493_v51  ;;  %2702 = vmatprep.mubr.bf16.mxu1 %v493_v51  ;;  %v453_v51 = vld [vmem:[%s5844_s25 + $0x4c8] sm:$0xff]  ;;  %v524_v55 = vpack.c.bf16 %v436_v49, %v428_v47  ;;  %v366_v49 = vld [vmem:[%s5844_s25 + $0x210] sm:$0xff] }
  0xf1   : > { %2776 = vmatpush1.bf16.msra.mxu1 %v4888_v50  ;;  %2241 = vmatprep.subr.bf16.mxu0 %v4899_v52  ;;  %v445_v50 = vld [vmem:[%s5844_s25 + $0x488] sm:$0xff] }
  0xf2   : > { %2777 = vmatprep.subr.bf16.mxu1 %v4896_v53  ;;  %2242 = vmatpush1.bf16.msra.mxu0 %v4897_v54  ;;  %v4948_v52 = vld [vmem:[#allocation5 + $0x3e8] ss:$16 sps:$4 sm:$0xff]   ;;  %v4945_v53 = vld [vmem:[#allocation5 + $0x3c0] ss:$16 sps:$4 sm:$0xff]   ;;  %v4956_v54 = vld [vmem:[#allocation5 + $0x40c] ss:$16 sps:$4 sm:$0xff]  }
  0xf3   : > { %2243 = vmatprep.subr.bf16.mxu0 %v4902_v56  ;;  %v533_v56 = vpack.c.bf16 %v453_v51, %v445_v50  ;;  %v374_v50 = vld [vmem:[%s5844_s25 + $0x250] sm:$0xff]  ;;  %v4992_v51 = vld [vmem:[#allocation5 + $0x4ec] ss:$16 sps:$4 sm:$0xff]  }
  0xf5   : > { %2778 = vmatpush1.bf16.msra.mxu1 %v4894_v58  ;;  %v4951_v58 = vld [vmem:[#allocation5 + $0x3e0] ss:$16 sps:$4 sm:$0xff]  }
  0xf6   : > { %2779 = vmatprep.subr.bf16.mxu1 %v4905_v62  ;;  %2244 = vmatpush1.bf16.msra.mxu0 %v4900_v61  ;;  %v4965_v61 = vld [vmem:[#allocation5 + $0x404] ss:$16 sps:$4 sm:$0xff]   ;;  %v303_v62 = vld [vmem:[%s5844_s25 + $0x18] sm:$0xff] }
  0xf7   : > { %2171 = vmatmul.mubr.bf16.gmra.mrb[16].mxu0 %v492_v63  ;;  %2703 = vmatmul.mubr.bf16.gmra.mrb[16].mxu1 %v492_v63  ;;  %v311_v63 = vld [vmem:[%s5844_s25 + $0x58] sm:$0xff] }
  0xf8   : > { %2180 = vmatprep.mubr.bf16.mxu0 %v501_v0  ;;  %2712 = vmatprep.mubr.bf16.mxu1 %v501_v0  ;;  %v532_v0 = vpack.c.bf16 %v452_v60, %v444_v59  ;;  %v494_v59 = vpack.c.bf16 %v374_v50, %v366_v49  ;;  %v5041_v49 = vld [vmem:[#allocation5 + $0x5c0] ss:$16 sps:$4 sm:$0xff]   ;;  %v5052_v50 = vld [vmem:[#allocation5 + $0x60c] ss:$16 sps:$4 sm:$0xff]  }
  0xf9   : > { %2780 = vmatpush1.bf16.msra.mxu1 %v4903_v1  ;;  %2245 = vmatprep.subr.bf16.mxu0 %v4908_v2  ;;  %v463_v1 = vpack.c.bf16 %v311_v63, %v303_v62  ;;  %v302_v2 = vld [vmem:[%s5844_s25 + $0x10] sm:$0xff] }
  0xfa   : > { %2246 = vmatpush1.bf16.msra.mxu0 %v4906_v4  ;;  %2781 = vmatprep.subr.bf16.mxu1 %v4911_v5  ;;  %v319_v4 = vld [vmem:[%s5844_s25 + $0x98] sm:$0xff]  ;;  %v462_v6 = vpack.c.bf16 %v310_v3, %v302_v2  ;;  %v5004_v62 = vld [vmem:[#allocation5 + $0x4e4] ss:$16 sps:$4 sm:$0xff]   ;;  %v5002_v63 = vld [vmem:[#allocation5 + $0x4e0] ss:$16 sps:$4 sm:$0xff]  }
  0xfb   : > { %2247 = vmatprep.subr.bf16.mxu0 %v4914_v8  ;;  %v327_v5 = vld [vmem:[%s5844_s25 + $0xd8] sm:$0xff]  ;;  %v5010_v2 = vld [vmem:[#allocation5 + $0x504] ss:$16 sps:$4 sm:$0xff]  }
  0xfc   : > { %v471_v8 = vpack.c.bf16 %v327_v5, %v319_v4  ;;  %v390_v3 = vld [vmem:[%s5844_s25 + $0x2d0] sm:$0xff]  ;;  %v5005_v4 = vld [vmem:[#allocation5 + $0x528] ss:$16 sps:$4 sm:$0xff]  }
  0xfd   : > { %2782 = vmatpush1.bf16.msra.mxu1 %v4909_v7  ;;  %v4954_v7 = vld [vmem:[#allocation5 + $0x408] ss:$16 sps:$4 sm:$0xff]  }
  0xfe   : > { %2248 = vmatpush1.bf16.msra.mxu0 %v4912_v11  ;;  %2783 = vmatprep.subr.bf16.mxu1 %v4917_v12  ;;  %v4963_v11 = vld [vmem:[#allocation5 + $0x400] ss:$16 sps:$4 sm:$0xff]   ;;  %v399_v5 = vld [vmem:[%s5844_s25 + $0x318] sm:$0xff] }
  0xff   : > { %2181 = vmatmul.mubr.bf16.gmra.mrb[20].mxu0 %v500_v13  ;;  %2713 = vmatmul.mubr.bf16.gmra.mrb[20].mxu1 %v500_v13  ;;  %v318_v12 = vld [vmem:[%s5844_s25 + $0x90] sm:$0xff] }
 0x100   : > { %2190 = vmatprep.mubr.bf16.mxu0 %v509_v14  ;;  %2722 = vmatprep.mubr.bf16.mxu1 %v509_v14  ;;  %v4971_v13 = vld [vmem:[#allocation5 + $0x424] ss:$16 sps:$4 sm:$0xff]  }
 0x101   : > { %2784 = vmatpush1.bf16.msra.mxu1 %v4915_v15  ;;  %2249 = vmatprep.subr.bf16.mxu0 %v4920_v17  ;;  %v326_v14 = vld [vmem:[%s5844_s25 + $0xd0] sm:$0xff]  ;;  %v4962_v15 = vld [vmem:[#allocation5 + $0x44c] ss:$16 sps:$4 sm:$0xff]  }
 0x102   : > { %2250 = vmatpush1.bf16.msra.mxu0 %v4918_v16  ;;  %2785 = vmatprep.subr.bf16.mxu1 %v4923_v19  ;;  %v335_v16 = vld [vmem:[%s5844_s25 + $0x118] sm:$0xff]  ;;  %v470_v19 = vpack.c.bf16 %v326_v14, %v318_v12  ;;  %v5016_v12 = vld [vmem:[#allocation5 + $0x524] ss:$16 sps:$4 sm:$0xff]   ;;  %v5014_v14 = vld [vmem:[#allocation5 + $0x520] ss:$16 sps:$4 sm:$0xff]  }
 0x103   : > { %2251 = vmatprep.subr.bf16.mxu0 %v4926_v20  ;;  %v343_v17 = vld [vmem:[%s5844_s25 + $0x158] sm:$0xff] }
 0x104   : > { %v4960_v20 = vld [vmem:[#allocation5 + $0x448] ss:$16 sps:$4 sm:$0xff]   ;;  %v479_v21 = vpack.c.bf16 %v343_v17, %v335_v16  ;;  %v406_v16 = vld [vmem:[%s5844_s25 + $0x350] sm:$0xff] }
 0x105   : > { %2786 = vmatpush1.bf16.msra.mxu1 %v4921_v24  ;;  %v334_v24 = vld [vmem:[%s5844_s25 + $0x110] sm:$0xff]  ;;  %v415_v17 = vld [vmem:[%s5844_s25 + $0x398] sm:$0xff] }
 0x106   : > { %2252 = vmatpush1.bf16.msra.mxu0 %v4924_v25  ;;  %2787 = vmatprep.subr.bf16.mxu1 %v4932_v26  ;;  %v342_v25 = vld [vmem:[%s5844_s25 + $0x150] sm:$0xff] }
 0x107   : > { %2191 = vmatmul.mubr.bf16.gmra.mrb[24].mxu0 %v508_v27  ;;  %2723 = vmatmul.mubr.bf16.gmra.mrb[24].mxu1 %v508_v27  ;;  %v4977_v26 = vld [vmem:[#allocation5 + $0x444] ss:$16 sps:$4 sm:$0xff]   ;;  %v4974_v27 = vld [vmem:[#allocation5 + $0x48c] ss:$16 sps:$4 sm:$0xff]   ;;  %v478_v32 = vpack.c.bf16 %v342_v25, %v334_v24 }
 0x108   : > { %2200 = vmatprep.mubr.bf16.mxu0 %v517_v28  ;;  %2732 = vmatprep.mubr.bf16.mxu1 %v517_v28  ;;  %v351_v28 = vld [vmem:[%s5844_s25 + $0x198] sm:$0xff]  ;;  %v5025_v25 = vld [vmem:[#allocation5 + $0x564] ss:$16 sps:$4 sm:$0xff]  }
 0x109   : > { %2253 = vmatprep.subr.bf16.mxu0 %v4929_v29  ;;  %2788 = vmatpush1.bf16.msra.mxu1 %v4930_v30  ;;  %v4975_v29 = vld [vmem:[#allocation5 + $0x440] ss:$16 sps:$4 sm:$0xff]   ;;  %v4983_v30 = vld [vmem:[#allocation5 + $0x464] ss:$16 sps:$4 sm:$0xff]  }
 0x10a   : > { %2254 = vmatpush1.bf16.msra.mxu0 %v4927_v33  ;;  %2789 = vmatprep.subr.bf16.mxu1 %v4938_v34  ;;  %v4972_v33 = vld [vmem:[#allocation5 + $0x488] ss:$16 sps:$4 sm:$0xff]   ;;  %v487_v34 = vpack.c.bf16 %v359_v31, %v351_v28  ;;  %v422_v28 = vld [vmem:[%s5844_s25 + $0x3d0] sm:$0xff] }
 0x10b   : > { %2255 = vmatprep.subr.bf16.mxu0 %v4935_v36  ;;  %v350_v36 = vld [vmem:[%s5844_s25 + $0x190] sm:$0xff]  ;;  %v431_v31 = vld [vmem:[%s5844_s25 + $0x418] sm:$0xff] }
 0x10d   : > { %2790 = vmatpush1.bf16.msra.mxu1 %v4936_v38  ;;  %v4981_v38 = vld [vmem:[#allocation5 + $0x460] ss:$16 sps:$4 sm:$0xff]  }
 0x10e   : > { %2256 = vmatpush1.bf16.msra.mxu0 %v4933_v39  ;;  %2791 = vmatprep.subr.bf16.mxu1 %v4944_v40  ;;  %v4989_v39 = vld [vmem:[#allocation5 + $0x484] ss:$16 sps:$4 sm:$0xff]   ;;  %v4978_v40 = vld [vmem:[#allocation5 + $0x4a8] ss:$16 sps:$4 sm:$0xff]  }
 0x10f   : > { %2201 = vmatmul.mubr.bf16.gmra.mrb[28].mxu0 %v516_v41  ;;  %2733 = vmatmul.mubr.bf16.gmra.mrb[28].mxu1 %v516_v41  ;;  %v4986_v41 = vld [vmem:[#allocation5 + $0x4cc] ss:$16 sps:$4 sm:$0xff]  }
 0x110   : > { %2210 = vmatprep.mubr.bf16.mxu0 %v525_v42  ;;  %2742 = vmatprep.mubr.bf16.mxu1 %v525_v42  ;;  %v367_v42 = vld [vmem:[%s5844_s25 + $0x218] sm:$0xff] }
 0x111   : > { %2257 = vmatprep.subr.bf16.mxu0 %v4941_v43  ;;  %2792 = vmatpush1.bf16.msra.mxu1 %v4942_v44  ;;  %v375_v43 = vld [vmem:[%s5844_s25 + $0x258] sm:$0xff]  ;;  %v4987_v44 = vld [vmem:[#allocation5 + $0x480] ss:$16 sps:$4 sm:$0xff]  }
 0x112   : > { %2258 = vmatpush1.bf16.msra.mxu0 %v4939_v45  ;;  %2793 = vmatprep.subr.bf16.mxu1 %v4950_v46  ;;  %v486_v45 = vpack.c.bf16 %v358_v37, %v350_v36  ;;  %v4984_v46 = vld [vmem:[#allocation5 + $0x4c8] ss:$16 sps:$4 sm:$0xff]   ;;  %v495_v47 = vpack.c.bf16 %v375_v43, %v367_v42  ;;  %v5040_v36 = vld [vmem:[#allocation5 + $0x5cc] ss:$16 sps:$4 sm:$0xff]   ;;  %v430_v43 = vld [vmem:[%s5844_s25 + $0x410] sm:$0xff] }
 0x113   : > { %2259 = vmatprep.subr.bf16.mxu0 %v4947_v48  ;;  %v4995_v48 = vld [vmem:[#allocation5 + $0x4a4] ss:$16 sps:$4 sm:$0xff]   ;;  %v5046_v42 = vld [vmem:[#allocation5 + $0x5ec] ss:$16 sps:$4 sm:$0xff]  }
 0x115   : > { %2794 = vmatpush1.bf16.msra.mxu1 %v4948_v52  ;;  %v4993_v52 = vld [vmem:[#allocation5 + $0x4a0] ss:$16 sps:$4 sm:$0xff]  }
 0x116   : > { %2260 = vmatpush1.bf16.msra.mxu0 %v4945_v53  ;;  %2896 = vmatprep.subr.bf16.mxu1 %v4956_v54  ;;  %v4990_v53 = vld [vmem:[#allocation5 + $0x4e8] ss:$16 sps:$4 sm:$0xff]   ;;  %v4998_v54 = vld [vmem:[#allocation5 + $0x4c4] ss:$16 sps:$4 sm:$0xff]  }
 0x117   : > { %2211 = vmatmul.mubr.bf16.gmra.mrb[32].mxu0 %v524_v55  ;;  %2743 = vmatmul.mubr.bf16.gmra.mrb[32].mxu1 %v524_v55  ;;  %v383_v55 = vld [vmem:[%s5844_s25 + $0x298] sm:$0xff] }
 0x118   : > { %2220 = vmatprep.mubr.bf16.mxu0 %v533_v56  ;;  %2752 = vmatprep.mubr.bf16.mxu1 %v533_v56  ;;  %v391_v56 = vld [vmem:[%s5844_s25 + $0x2d8] sm:$0xff] }
 0x119   : > { %2261 = vmatprep.subr.bf16.mxu0 %v4953_v57  ;;  %v4996_v57 = vld [vmem:[#allocation5 + $0x4c0] ss:$16 sps:$4 sm:$0xff]   ;;  %v503_v60 = vpack.c.bf16 %v391_v56, %v383_v55  ;;  %v5061_v55 = vld [vmem:[#allocation5 + $0x604] ss:$16 sps:$4 sm:$0xff]  }
 0x11a   : > { %2262 = vmatpush1.bf16.msra.mxu0 %v4951_v58  ;;  %v5001_v58 = vld [vmem:[#allocation5 + $0x50c] ss:$16 sps:$4 sm:$0xff]   ;;  %v446_v56 = vld [vmem:[%s5844_s25 + $0x490] sm:$0xff] }
 0x11b   : > { %2364 = vmatprep.subr.bf16.mxu0 %v4965_v61  ;;  %v4999_v61 = vld [vmem:[#allocation5 + $0x508] ss:$16 sps:$4 sm:$0xff]  }
 0x11f   : > { %2221 = vmatmul.mubr.bf16.gmra.mrb[36].mxu0 %v532_v0  ;;  %2753 = vmatmul.mubr.bf16.gmra.mrb[36].mxu1 %v532_v0  ;;  %v5007_v0 = vld [vmem:[#allocation5 + $0x52c] ss:$16 sps:$4 sm:$0xff]  }
 0x120   : > { %2263 = vmatprep.mubr.bf16.mxu0 %v463_v1  ;;  %2795 = vmatprep.mubr.bf16.mxu1 %v463_v1  ;;  %v382_v1 = vld [vmem:[%s5844_s25 + $0x290] sm:$0xff] }
 0x127   : > { %2264 = vmatmul.mubr.bf16.vlgmr.msra.gmra.mrb[0].mxu0 %v462_v6  ;;  %2796 = vmatmul.mubr.bf16.vlgmr.msra.gmra.mrb[0].mxu1 %v462_v6  ;;  %v407_v6 = vld [vmem:[%s5844_s25 + $0x358] sm:$0xff] }
 0x128   : > { %2897 = vmatpush1.bf16.msra.mxu1 %v4954_v7  ;;  %2273 = vmatprep.mubr.bf16.mxu0 %v471_v8  ;;  %v5008_v7 = vld [vmem:[#allocation5 + $0x500] ss:$16 sps:$4 sm:$0xff]  }
 0x129   : > { %2898 = vmatprep.subr.bf16.mxu1 %v4959_v9  ;;  %2805 = vmatprep.mubr.bf16.mxu1 %v471_v8  ;;  %v5013_v8 = vld [vmem:[#allocation5 + $0x54c] ss:$16 sps:$4 sm:$0xff]   ;;  %v502_v9 = vpack.c.bf16 %v390_v3, %v382_v1  ;;  %v5050_v3 = vld [vmem:[#allocation5 + $0x608] ss:$16 sps:$4 sm:$0xff]  }
 0x12a   : > { %2365 = vmatpush1.bf16.msra.mxu0 %v4963_v11  ;;  %v5011_v11 = vld [vmem:[#allocation5 + $0x548] ss:$16 sps:$4 sm:$0xff]  }
 0x12b   : > { %2366 = vmatprep.subr.bf16.mxu0 %v4971_v13  ;;  %v398_v13 = vld [vmem:[%s5844_s25 + $0x310] sm:$0xff]  ;;  %v329_v1 = vld [vmem:[%s5844_s25 + $0xe8] sm:$0xff] }
 0x12c   : > { %2899 = vmatpush1.bf16.msra.mxu1 %v4957_v10  ;;  %v511_v10 = vpack.c.bf16 %v407_v6, %v399_v5  ;;  %v5055_v5 = vld [vmem:[#allocation5 + $0x62c] ss:$16 sps:$4 sm:$0xff]   ;;  %v5059_v6 = vld [vmem:[#allocation5 + $0x600] ss:$16 sps:$4 sm:$0xff]  }
 0x12d   : > { %2900 = vmatprep.subr.bf16.mxu1 %v4962_v15  ;;  %v5019_v15 = vld [vmem:[#allocation5 + $0x56c] ss:$16 sps:$4 sm:$0xff]  }
 0x12e   : > { %2367 = vmatpush1.bf16.msra.mxu0 %v4969_v18  ;;  %v5022_v18 = vld [vmem:[#allocation5 + $0x544] ss:$16 sps:$4 sm:$0xff]  }
 0x12f   : > { %2274 = vmatmul.mubr.bf16.gmra.mrb[4].mxu0 %v470_v19  ;;  %2806 = vmatmul.mubr.bf16.gmra.mrb[4].mxu1 %v470_v19  ;;  %v423_v19 = vld [vmem:[%s5844_s25 + $0x3d8] sm:$0xff] }
 0x130   : > { %2901 = vmatpush1.bf16.msra.mxu1 %v4960_v20  ;;  %2283 = vmatprep.mubr.bf16.mxu0 %v479_v21  ;;  %v5017_v20 = vld [vmem:[#allocation5 + $0x568] ss:$16 sps:$4 sm:$0xff]   ;;  %v519_v24 = vpack.c.bf16 %v423_v19, %v415_v17  ;;  %v5073_v19 = vld [vmem:[#allocation5 + $0x644] ss:$16 sps:$4 sm:$0xff]  }
 0x131   : > { %2815 = vmatprep.mubr.bf16.mxu1 %v479_v21  ;;  %2902 = vmatprep.subr.bf16.mxu1 %v4968_v22  ;;  %v5020_v21 = vld [vmem:[#allocation5 + $0x540] ss:$16 sps:$4 sm:$0xff]   ;;  %v5028_v22 = vld [vmem:[#allocation5 + $0x58c] ss:$16 sps:$4 sm:$0xff]  }
 0x132   : > { %2368 = vmatprep.subr.bf16.mxu0 %v4977_v26  ;;  %v5026_v26 = vld [vmem:[#allocation5 + $0x588] ss:$16 sps:$4 sm:$0xff]  }
 0x133   : > { %2369 = vmatpush1.bf16.msra.mxu0 %v4975_v29  ;;  %v5023_v29 = vld [vmem:[#allocation5 + $0x560] ss:$16 sps:$4 sm:$0xff]  }
 0x134   : > { %2903 = vmatpush1.bf16.msra.mxu1 %v4966_v23  ;;  %2370 = vmatprep.subr.bf16.mxu0 %v4983_v30  ;;  %v510_v23 = vpack.c.bf16 %v406_v16, %v398_v13  ;;  %v5034_v30 = vld [vmem:[#allocation5 + $0x5ac] ss:$16 sps:$4 sm:$0xff]   ;;  %v5056_v16 = vld [vmem:[#allocation5 + $0x648] ss:$16 sps:$4 sm:$0xff]  }
 0x135   : > { %2904 = vmatprep.subr.bf16.mxu1 %v4974_v27  ;;  %v414_v27 = vld [vmem:[%s5844_s25 + $0x390] sm:$0xff]  ;;  %v345_v13 = vld [vmem:[%s5844_s25 + $0x168] sm:$0xff] }
 0x136   : > { %v518_v37 = vpack.c.bf16 %v422_v28, %v414_v27  ;;  %v361_v27 = vld [vmem:[%s5844_s25 + $0x1e8] sm:$0xff] }
 0x137   : > { %2284 = vmatmul.mubr.bf16.gmra.mrb[8].mxu0 %v478_v32  ;;  %2816 = vmatmul.mubr.bf16.gmra.mrb[8].mxu1 %v478_v32  ;;  %v5031_v32 = vld [vmem:[#allocation5 + $0x584] ss:$16 sps:$4 sm:$0xff]  }
 0x138   : > { %2905 = vmatpush1.bf16.msra.mxu1 %v4972_v33  ;;  %2293 = vmatprep.mubr.bf16.mxu0 %v487_v34  ;;  %v439_v33 = vld [vmem:[%s5844_s25 + $0x458] sm:$0xff] }
 0x139   : > { %2825 = vmatprep.mubr.bf16.mxu1 %v487_v34  ;;  %2906 = vmatprep.subr.bf16.mxu1 %v4980_v35  ;;  %v5032_v34 = vld [vmem:[#allocation5 + $0x5a8] ss:$16 sps:$4 sm:$0xff]   ;;  %v5029_v35 = vld [vmem:[#allocation5 + $0x580] ss:$16 sps:$4 sm:$0xff]  }
 0x13a   : > { %2371 = vmatpush1.bf16.msra.mxu0 %v4981_v38  ;;  %v527_v38 = vpack.c.bf16 %v439_v33, %v431_v31  ;;  %v5076_v31 = vld [vmem:[#allocation5 + $0x6ac] ss:$16 sps:$4 sm:$0xff]   ;;  %v5085_v33 = vld [vmem:[#allocation5 + $0x684] ss:$16 sps:$4 sm:$0xff]  }
 0x13b   : > { %2372 = vmatprep.subr.bf16.mxu0 %v4989_v39  ;;  %v5037_v39 = vld [vmem:[#allocation5 + $0x5a4] ss:$16 sps:$4 sm:$0xff]  }
 0x13c   : > { %2907 = vmatpush1.bf16.msra.mxu1 %v4978_v40  ;;  %v5038_v40 = vld [vmem:[#allocation5 + $0x5c8] ss:$16 sps:$4 sm:$0xff]  }
 0x13d   : > { %2908 = vmatprep.subr.bf16.mxu1 %v4986_v41  ;;  %v5035_v41 = vld [vmem:[#allocation5 + $0x5a0] ss:$16 sps:$4 sm:$0xff]  }
 0x13e   : > { %2373 = vmatpush1.bf16.msra.mxu0 %v4987_v44  ;;  %v5043_v44 = vld [vmem:[#allocation5 + $0x5c4] ss:$16 sps:$4 sm:$0xff]  }
 0x13f   : > { %2294 = vmatmul.mubr.bf16.gmra.mrb[12].mxu0 %v486_v45  ;;  %2826 = vmatmul.mubr.bf16.gmra.mrb[12].mxu1 %v486_v45  ;;  %v438_v45 = vld [vmem:[%s5844_s25 + $0x450] sm:$0xff] }
 0x140   : > { %2303 = vmatprep.mubr.bf16.mxu0 %v495_v47  ;;  %2835 = vmatprep.mubr.bf16.mxu1 %v495_v47  ;;  %v455_v47 = vld [vmem:[%s5844_s25 + $0x4d8] sm:$0xff] }
 0x141   : > { %2909 = vmatpush1.bf16.msra.mxu1 %v4984_v46  ;;  %2374 = vmatprep.subr.bf16.mxu0 %v4995_v48  ;;  %v447_v46 = vld [vmem:[%s5844_s25 + $0x498] sm:$0xff] }
 0x142   : > { %2910 = vmatprep.subr.bf16.mxu1 %v4992_v51  ;;  %2375 = vmatpush1.bf16.msra.mxu0 %v4993_v52  ;;  %v5044_v48 = vld [vmem:[#allocation5 + $0x5e8] ss:$16 sps:$4 sm:$0xff]   ;;  %v526_v51 = vpack.c.bf16 %v438_v45, %v430_v43  ;;  %v535_v52 = vpack.c.bf16 %v455_v47, %v447_v46  ;;  %v5088_v45 = vld [vmem:[#allocation5 + $0x6ec] ss:$16 sps:$4 sm:$0xff]   ;;  %v5089_v46 = vld [vmem:[#allocation5 + $0x6a0] ss:$16 sps:$4 sm:$0xff]  }
 0x143   : > { %2376 = vmatprep.subr.bf16.mxu0 %v4998_v54  ;;  %v5047_v54 = vld [vmem:[#allocation5 + $0x5e0] ss:$16 sps:$4 sm:$0xff]   ;;  %v5080_v43 = vld [vmem:[#allocation5 + $0x6c8] ss:$16 sps:$4 sm:$0xff]   ;;  %v5094_v47 = vld [vmem:[#allocation5 + $0x6c4] ss:$16 sps:$4 sm:$0xff]  }
 0x145   : > { %2911 = vmatpush1.bf16.msra.mxu1 %v4990_v53  ;;  %v5049_v53 = vld [vmem:[#allocation5 + $0x5e4] ss:$16 sps:$4 sm:$0xff]  }
 0x146   : > { %2912 = vmatprep.subr.bf16.mxu1 %v5001_v58  ;;  %2377 = vmatpush1.bf16.msra.mxu0 %v4996_v57  ;;  %v454_v57 = vld [vmem:[%s5844_s25 + $0x4d0] sm:$0xff]  ;;  %v305_v58 = vld [vmem:[%s5844_s25 + $0x28] sm:$0xff] }
 0x147   : > { %2304 = vmatmul.mubr.bf16.gmra.mrb[16].mxu0 %v494_v59  ;;  %2836 = vmatmul.mubr.bf16.gmra.mrb[16].mxu1 %v494_v59  ;;  %v313_v59 = vld [vmem:[%s5844_s25 + $0x68] sm:$0xff] }
 0x148   : > { %2313 = vmatprep.mubr.bf16.mxu0 %v503_v60  ;;  %2845 = vmatprep.mubr.bf16.mxu1 %v503_v60  ;;  %v534_v60 = vpack.c.bf16 %v454_v57, %v446_v56  ;;  %v5095_v57 = vld [vmem:[#allocation5 + $0x708] ss:$16 sps:$4 sm:$0xff]  }
 0x149   : > { %2913 = vmatpush1.bf16.msra.mxu1 %v4999_v61  ;;  %2378 = vmatprep.subr.bf16.mxu0 %v5004_v62  ;;  %v465_v61 = vpack.c.bf16 %v313_v59, %v305_v58  ;;  %v304_v62 = vld [vmem:[%s5844_s25 + $0x20] sm:$0xff] }
 0x14a   : > { %2379 = vmatpush1.bf16.msra.mxu0 %v5002_v63  ;;  %2914 = vmatprep.subr.bf16.mxu1 %v5007_v0  ;;  %v312_v63 = vld [vmem:[%s5844_s25 + $0x60] sm:$0xff]  ;;  %v321_v0 = vld [vmem:[%s5844_s25 + $0xa8] sm:$0xff] }
 0x14b   : > { %2380 = vmatprep.subr.bf16.mxu0 %v5010_v2  ;;  %v464_v2 = vpack.c.bf16 %v312_v63, %v304_v62  ;;  %v5100_v58 = vld [vmem:[#allocation5 + $0x6e4] ss:$16 sps:$4 sm:$0xff]   ;;  %v5098_v59 = vld [vmem:[#allocation5 + $0x6e0] ss:$16 sps:$4 sm:$0xff]  }
 0x14c   : > { %v384_v62 = vld [vmem:[%s5844_s25 + $0x2a0] sm:$0xff] }
 0x14d   : > { %2915 = vmatpush1.bf16.msra.mxu1 %v5005_v4  ;;  %v473_v4 = vpack.c.bf16 %v329_v1, %v321_v0  ;;  %v392_v63 = vld [vmem:[%s5844_s25 + $0x2e0] sm:$0xff]  ;;  %v5101_v0 = vld [vmem:[#allocation5 + $0x728] ss:$16 sps:$4 sm:$0xff]  }
 0x14e   : > { %2381 = vmatpush1.bf16.msra.mxu0 %v5008_v7  ;;  %2916 = vmatprep.subr.bf16.mxu1 %v5013_v8  ;;  %v5067_v7 = vld [vmem:[#allocation5 + $0x624] ss:$16 sps:$4 sm:$0xff]   ;;  %v5053_v8 = vld [vmem:[#allocation5 + $0x628] ss:$16 sps:$4 sm:$0xff]  }
 0x14f   : > { %2314 = vmatmul.mubr.bf16.gmra.mrb[20].mxu0 %v502_v9  ;;  %2846 = vmatmul.mubr.bf16.gmra.mrb[20].mxu1 %v502_v9  ;;  %v320_v9 = vld [vmem:[%s5844_s25 + $0xa0] sm:$0xff]  ;;  %v401_v1 = vld [vmem:[%s5844_s25 + $0x328] sm:$0xff] }
 0x150   : > { %2323 = vmatprep.mubr.bf16.mxu0 %v511_v10  ;;  %2855 = vmatprep.mubr.bf16.mxu1 %v511_v10  ;;  %v328_v10 = vld [vmem:[%s5844_s25 + $0xe0] sm:$0xff] }
 0x151   : > { %2917 = vmatpush1.bf16.msra.mxu1 %v5011_v11  ;;  %2382 = vmatprep.subr.bf16.mxu0 %v5016_v12  ;;  %v5058_v11 = vld [vmem:[#allocation5 + $0x64c] ss:$16 sps:$4 sm:$0xff]  }
 0x152   : > { %2383 = vmatpush1.bf16.msra.mxu0 %v5014_v14  ;;  %2918 = vmatprep.subr.bf16.mxu1 %v5019_v15  ;;  %v337_v12 = vld [vmem:[%s5844_s25 + $0x128] sm:$0xff]  ;;  %v5065_v14 = vld [vmem:[#allocation5 + $0x620] ss:$16 sps:$4 sm:$0xff]   ;;  %v472_v15 = vpack.c.bf16 %v328_v10, %v320_v9 }
 0x153   : > { %2384 = vmatprep.subr.bf16.mxu0 %v5022_v18  ;;  %v481_v17 = vpack.c.bf16 %v345_v13, %v337_v12  ;;  %v5064_v18 = vld [vmem:[#allocation5 + $0x66c] ss:$16 sps:$4 sm:$0xff]   ;;  %v5110_v9 = vld [vmem:[#allocation5 + $0x720] ss:$16 sps:$4 sm:$0xff]  }
 0x154   : > { %v5115_v10 = vld [vmem:[#allocation5 + $0x76c] ss:$16 sps:$4 sm:$0xff]   ;;  %v400_v12 = vld [vmem:[%s5844_s25 + $0x320] sm:$0xff] }
 0x155   : > { %2919 = vmatpush1.bf16.msra.mxu1 %v5017_v20  ;;  %v5062_v20 = vld [vmem:[#allocation5 + $0x668] ss:$16 sps:$4 sm:$0xff]   ;;  %v408_v13 = vld [vmem:[%s5844_s25 + $0x360] sm:$0xff] }
 0x156   : > { %2385 = vmatpush1.bf16.msra.mxu0 %v5020_v21  ;;  %2920 = vmatprep.subr.bf16.mxu1 %v5028_v22  ;;  %v5071_v21 = vld [vmem:[#allocation5 + $0x640] ss:$16 sps:$4 sm:$0xff]  }
 0x157   : > { %2324 = vmatmul.mubr.bf16.gmra.mrb[24].mxu0 %v510_v23  ;;  %2856 = vmatmul.mubr.bf16.gmra.mrb[24].mxu1 %v510_v23  ;;  %v336_v22 = vld [vmem:[%s5844_s25 + $0x120] sm:$0xff] }
 0x158   : > { %2333 = vmatprep.mubr.bf16.mxu0 %v519_v24  ;;  %2865 = vmatprep.mubr.bf16.mxu1 %v519_v24  ;;  %v344_v23 = vld [vmem:[%s5844_s25 + $0x160] sm:$0xff] }
 0x159   : > { %2386 = vmatprep.subr.bf16.mxu0 %v5025_v25  ;;  %2921 = vmatpush1.bf16.msra.mxu1 %v5026_v26  ;;  %v5079_v24 = vld [vmem:[#allocation5 + $0x664] ss:$16 sps:$4 sm:$0xff]   ;;  %v5070_v25 = vld [vmem:[#allocation5 + $0x68c] ss:$16 sps:$4 sm:$0xff]   ;;  %v480_v28 = vpack.c.bf16 %v344_v23, %v336_v22  ;;  %v5122_v22 = vld [vmem:[#allocation5 + $0x788] ss:$16 sps:$4 sm:$0xff]  }
 0x15a   : > { %2387 = vmatpush1.bf16.msra.mxu0 %v5023_v29  ;;  %2922 = vmatprep.subr.bf16.mxu1 %v5034_v30  ;;  %v353_v26 = vld [vmem:[%s5844_s25 + $0x1a8] sm:$0xff]  ;;  %v5119_v23 = vld [vmem:[#allocation5 + $0x760] ss:$16 sps:$4 sm:$0xff]  }
 0x15b   : > { %2388 = vmatprep.subr.bf16.mxu0 %v5031_v32  ;;  %v5068_v29 = vld [vmem:[#allocation5 + $0x688] ss:$16 sps:$4 sm:$0xff]   ;;  %v489_v30 = vpack.c.bf16 %v361_v27, %v353_v26  ;;  %v5077_v32 = vld [vmem:[#allocation5 + $0x660] ss:$16 sps:$4 sm:$0xff]  }
 0x15c   : > { %v416_v26 = vld [vmem:[%s5844_s25 + $0x3a0] sm:$0xff] }
 0x15d   : > { %2923 = vmatpush1.bf16.msra.mxu1 %v5032_v34  ;;  %v352_v34 = vld [vmem:[%s5844_s25 + $0x1a0] sm:$0xff] }
 0x15e   : > { %2389 = vmatpush1.bf16.msra.mxu0 %v5029_v35  ;;  %2924 = vmatprep.subr.bf16.mxu1 %v5040_v36  ;;  %v360_v35 = vld [vmem:[%s5844_s25 + $0x1e0] sm:$0xff]  ;;  %v5074_v36 = vld [vmem:[#allocation5 + $0x6a8] ss:$16 sps:$4 sm:$0xff]  }
 0x15f   : > { %2334 = vmatmul.mubr.bf16.gmra.mrb[28].mxu0 %v518_v37  ;;  %2866 = vmatmul.mubr.bf16.gmra.mrb[28].mxu1 %v518_v37  ;;  %v5082_v37 = vld [vmem:[#allocation5 + $0x6cc] ss:$16 sps:$4 sm:$0xff]   ;;  %v424_v27 = vld [vmem:[%s5844_s25 + $0x3e0] sm:$0xff] }
 0x160   : > { %2343 = vmatprep.mubr.bf16.mxu0 %v527_v38  ;;  %2875 = vmatprep.mubr.bf16.mxu1 %v527_v38  ;;  %v369_v38 = vld [vmem:[%s5844_s25 + $0x228] sm:$0xff] }
 0x161   : > { %2390 = vmatprep.subr.bf16.mxu0 %v5037_v39  ;;  %2925 = vmatpush1.bf16.msra.mxu1 %v5038_v40  ;;  %v377_v39 = vld [vmem:[%s5844_s25 + $0x268] sm:$0xff]  ;;  %v5083_v40 = vld [vmem:[#allocation5 + $0x680] ss:$16 sps:$4 sm:$0xff]  }
 0x162   : > { %2391 = vmatpush1.bf16.msra.mxu0 %v5035_v41  ;;  %2926 = vmatprep.subr.bf16.mxu1 %v5046_v42  ;;  %v488_v41 = vpack.c.bf16 %v360_v35, %v352_v34  ;;  %v497_v42 = vpack.c.bf16 %v377_v39, %v369_v38  ;;  %v5133_v35 = vld [vmem:[#allocation5 + $0x7a4] ss:$16 sps:$4 sm:$0xff]   ;;  %v5142_v38 = vld [vmem:[#allocation5 + $0x7ec] ss:$16 sps:$4 sm:$0xff]  }
 0x163   : > { %2392 = vmatprep.subr.bf16.mxu0 %v5043_v44  ;;  %v5091_v44 = vld [vmem:[#allocation5 + $0x6a4] ss:$16 sps:$4 sm:$0xff]  }
 0x164   : > { %v5139_v39 = vld [vmem:[#allocation5 + $0x7c4] ss:$16 sps:$4 sm:$0xff]  }
 0x165   : > { %2927 = vmatpush1.bf16.msra.mxu1 %v5044_v48  ;;  %v368_v48 = vld [vmem:[%s5844_s25 + $0x220] sm:$0xff] }
 0x166   : > { %2393 = vmatpush1.bf16.msra.mxu0 %v5041_v49  ;;  %3029 = vmatprep.subr.bf16.mxu1 %v5052_v50  ;;  %v376_v49 = vld [vmem:[%s5844_s25 + $0x260] sm:$0xff]  ;;  %v5086_v50 = vld [vmem:[#allocation5 + $0x6e8] ss:$16 sps:$4 sm:$0xff]  }
 0x167   : > { %2344 = vmatmul.mubr.bf16.gmra.mrb[32].mxu0 %v526_v51  ;;  %2876 = vmatmul.mubr.bf16.gmra.mrb[32].mxu1 %v526_v51  ;;  %v385_v51 = vld [vmem:[%s5844_s25 + $0x2a8] sm:$0xff] }
 0x168   : > { %2353 = vmatprep.mubr.bf16.mxu0 %v535_v52  ;;  %2885 = vmatprep.mubr.bf16.mxu1 %v535_v52  ;;  %v393_v52 = vld [vmem:[%s5844_s25 + $0x2e8] sm:$0xff] }
 0x169   : > { %2394 = vmatprep.subr.bf16.mxu0 %v5049_v53  ;;  %v5092_v53 = vld [vmem:[#allocation5 + $0x6c0] ss:$16 sps:$4 sm:$0xff]   ;;  %v505_v56 = vpack.c.bf16 %v393_v52, %v385_v51  ;;  %v307_v52 = vld [vmem:[%s5844_s25 + $0x38] sm:$0xff] }
 0x16a   : > { %2395 = vmatpush1.bf16.msra.mxu0 %v5047_v54  ;;  %v5097_v54 = vld [vmem:[#allocation5 + $0x70c] ss:$16 sps:$4 sm:$0xff]   ;;  %v456_v51 = vld [vmem:[%s5844_s25 + $0x4e0] sm:$0xff] }
 0x16b   : > { %2497 = vmatprep.subr.bf16.mxu0 %v5061_v55  ;;  %v496_v55 = vpack.c.bf16 %v376_v49, %v368_v48  ;;  %v5145_v48 = vld [vmem:[#allocation5 + $0x7e4] ss:$16 sps:$4 sm:$0xff]   ;;  %v5143_v49 = vld [vmem:[#allocation5 + $0x7e0] ss:$16 sps:$4 sm:$0xff]  }
 0x16f   : > { %2354 = vmatmul.mubr.bf16.gmra.mrb[36].mxu0 %v534_v60  ;;  %2886 = vmatmul.mubr.bf16.gmra.mrb[36].mxu1 %v534_v60  ;;  %v5103_v60 = vld [vmem:[#allocation5 + $0x72c] ss:$16 sps:$4 sm:$0xff]  }
 0x170   : > { %2396 = vmatprep.mubr.bf16.mxu0 %v465_v61  ;;  %2928 = vmatprep.mubr.bf16.mxu1 %v465_v61  ;;  %v5106_v61 = vld [vmem:[#allocation5 + $0x704] ss:$16 sps:$4 sm:$0xff]  }
 0x177   : > { %2397 = vmatmul.mubr.bf16.vlgmr.msra.gmra.mrb[0].mxu0 %v464_v2  ;;  %2929 = vmatmul.mubr.bf16.vlgmr.msra.gmra.mrb[0].mxu1 %v464_v2  ;;  %v409_v2 = vld [vmem:[%s5844_s25 + $0x368] sm:$0xff] }
 0x178   : > { %3030 = vmatpush1.bf16.msra.mxu1 %v5050_v3  ;;  %2406 = vmatprep.mubr.bf16.mxu0 %v473_v4  ;;  %v5104_v3 = vld [vmem:[#allocation5 + $0x700] ss:$16 sps:$4 sm:$0xff]  }
 0x179   : > { %3031 = vmatprep.subr.bf16.mxu1 %v5055_v5  ;;  %2938 = vmatprep.mubr.bf16.mxu1 %v473_v4  ;;  %v5109_v4 = vld [vmem:[#allocation5 + $0x74c] ss:$16 sps:$4 sm:$0xff]   ;;  %v504_v5 = vpack.c.bf16 %v392_v63, %v384_v62  ;;  %v322_v62 = vld [vmem:[%s5844_s25 + $0xb0] sm:$0xff] }
 0x17a   : > { %2498 = vmatpush1.bf16.msra.mxu0 %v5059_v6  ;;  %v513_v6 = vpack.c.bf16 %v409_v2, %v401_v1  ;;  %v330_v63 = vld [vmem:[%s5844_s25 + $0xf0] sm:$0xff]  ;;  %v347_v1 = vld [vmem:[%s5844_s25 + $0x178] sm:$0xff] }
 0x17b   : > { %2499 = vmatprep.subr.bf16.mxu0 %v5067_v7  ;;  %v5107_v7 = vld [vmem:[#allocation5 + $0x748] ss:$16 sps:$4 sm:$0xff]   ;;  %v474_v2 = vpack.c.bf16 %v330_v63, %v322_v62 }
 0x17c   : > { %3032 = vmatpush1.bf16.msra.mxu1 %v5053_v8  ;;  %v5112_v8 = vld [vmem:[#allocation5 + $0x724] ss:$16 sps:$4 sm:$0xff]  }
 0x17d   : > { %3033 = vmatprep.subr.bf16.mxu1 %v5058_v11  ;;  %v5118_v11 = vld [vmem:[#allocation5 + $0x744] ss:$16 sps:$4 sm:$0xff]  }
 0x17e   : > { %2500 = vmatpush1.bf16.msra.mxu0 %v5065_v14  ;;  %v417_v14 = vld [vmem:[%s5844_s25 + $0x3a8] sm:$0xff] }
 0x17f   : > { %2407 = vmatmul.mubr.bf16.gmra.mrb[4].mxu0 %v472_v15  ;;  %2939 = vmatmul.mubr.bf16.gmra.mrb[4].mxu1 %v472_v15  ;;  %v425_v15 = vld [vmem:[%s5844_s25 + $0x3e8] sm:$0xff] }
 0x180   : > { %3034 = vmatpush1.bf16.msra.mxu1 %v5056_v16  ;;  %2416 = vmatprep.mubr.bf16.mxu0 %v481_v17  ;;  %v5113_v16 = vld [vmem:[#allocation5 + $0x768] ss:$16 sps:$4 sm:$0xff]  }
 0x181   : > { %2948 = vmatprep.mubr.bf16.mxu1 %v481_v17  ;;  %3035 = vmatprep.subr.bf16.mxu1 %v5064_v18  ;;  %v5116_v17 = vld [vmem:[#allocation5 + $0x740] ss:$16 sps:$4 sm:$0xff]   ;;  %v5124_v18 = vld [vmem:[#allocation5 + $0x78c] ss:$16 sps:$4 sm:$0xff]  }
 0x182   : > { %2501 = vmatprep.subr.bf16.mxu0 %v5073_v19  ;;  %v512_v19 = vpack.c.bf16 %v408_v13, %v400_v12  ;;  %v371_v12 = vld [vmem:[%s5844_s25 + $0x238] sm:$0xff] }
 0x183   : > { %2502 = vmatpush1.bf16.msra.mxu0 %v5071_v21  ;;  %v5121_v21 = vld [vmem:[#allocation5 + $0x764] ss:$16 sps:$4 sm:$0xff]   ;;  %v379_v13 = vld [vmem:[%s5844_s25 + $0x278] sm:$0xff] }
 0x184   : > { %3036 = vmatpush1.bf16.msra.mxu1 %v5062_v20  ;;  %2503 = vmatprep.subr.bf16.mxu0 %v5079_v24  ;;  %v521_v20 = vpack.c.bf16 %v425_v15, %v417_v14  ;;  %v5130_v24 = vld [vmem:[#allocation5 + $0x7ac] ss:$16 sps:$4 sm:$0xff]   ;;  %v499_v15 = vpack.c.bf16 %v379_v13, %v371_v12 }
 0x185   : > { %3037 = vmatprep.subr.bf16.mxu1 %v5070_v25  ;;  %v5127_v25 = vld [vmem:[#allocation5 + $0x784] ss:$16 sps:$4 sm:$0xff]  }
 0x187   : > { %2417 = vmatmul.mubr.bf16.gmra.mrb[8].mxu0 %v480_v28  ;;  %2949 = vmatmul.mubr.bf16.gmra.mrb[8].mxu1 %v480_v28  ;;  %v433_v28 = vld [vmem:[%s5844_s25 + $0x428] sm:$0xff] }
 0x188   : > { %3038 = vmatpush1.bf16.msra.mxu1 %v5068_v29  ;;  %2426 = vmatprep.mubr.bf16.mxu0 %v489_v30  ;;  %v441_v29 = vld [vmem:[%s5844_s25 + $0x468] sm:$0xff] }
 0x189   : > { %2958 = vmatprep.mubr.bf16.mxu1 %v489_v30  ;;  %3039 = vmatprep.subr.bf16.mxu1 %v5076_v31  ;;  %v5128_v30 = vld [vmem:[#allocation5 + $0x7a8] ss:$16 sps:$4 sm:$0xff]   ;;  %v5125_v31 = vld [vmem:[#allocation5 + $0x780] ss:$16 sps:$4 sm:$0xff]   ;;  %v529_v34 = vpack.c.bf16 %v441_v29, %v433_v28 }
 0x18a   : > { %2504 = vmatpush1.bf16.msra.mxu0 %v5077_v32  ;;  %v5136_v32 = vld [vmem:[#allocation5 + $0x7cc] ss:$16 sps:$4 sm:$0xff]   ;;  %v402_v28 = vld [vmem:[%s5844_s25 + $0x330] sm:$0xff] }
 0x18b   : > { %2505 = vmatprep.subr.bf16.mxu0 %v5085_v33  ;;  %v520_v33 = vpack.c.bf16 %v424_v27, %v416_v26  ;;  %v410_v29 = vld [vmem:[%s5844_s25 + $0x370] sm:$0xff] }
 0x18c   : > { %3040 = vmatpush1.bf16.msra.mxu1 %v5074_v36  ;;  %v5134_v36 = vld [vmem:[#allocation5 + $0x7c8] ss:$16 sps:$4 sm:$0xff]  }
 0x18d   : > { %3041 = vmatprep.subr.bf16.mxu1 %v5082_v37  ;;  %v5131_v37 = vld [vmem:[#allocation5 + $0x7a0] ss:$16 sps:$4 sm:$0xff]  }
 0x18e   : > { %2506 = vmatpush1.bf16.msra.mxu0 %v5083_v40  ;;  %v432_v40 = vld [vmem:[%s5844_s25 + $0x420] sm:$0xff] }
 0x18f   : > { %2427 = vmatmul.mubr.bf16.gmra.mrb[12].mxu0 %v488_v41  ;;  %2959 = vmatmul.mubr.bf16.gmra.mrb[12].mxu1 %v488_v41  ;;  %v440_v41 = vld [vmem:[%s5844_s25 + $0x460] sm:$0xff] }
 0x190   : > { %2436 = vmatprep.mubr.bf16.mxu0 %v497_v42  ;;  %2968 = vmatprep.mubr.bf16.mxu1 %v497_v42  ;;  %v449_v42 = vld [vmem:[%s5844_s25 + $0x4a8] sm:$0xff] }
 0x191   : > { %3042 = vmatpush1.bf16.msra.mxu1 %v5080_v43  ;;  %2507 = vmatprep.subr.bf16.mxu0 %v5091_v44  ;;  %v457_v43 = vld [vmem:[%s5844_s25 + $0x4e8] sm:$0xff] }
 0x192   : > { %3043 = vmatprep.subr.bf16.mxu1 %v5088_v45  ;;  %2508 = vmatpush1.bf16.msra.mxu0 %v5089_v46  ;;  %v5140_v44 = vld [vmem:[#allocation5 + $0x7e8] ss:$16 sps:$4 sm:$0xff]   ;;  %v5137_v45 = vld [vmem:[#allocation5 + $0x7c0] ss:$16 sps:$4 sm:$0xff]   ;;  %v528_v46 = vpack.c.bf16 %v440_v41, %v432_v40 }
 0x193   : > { %2509 = vmatprep.subr.bf16.mxu0 %v5094_v47  ;;  %v537_v47 = vpack.c.bf16 %v457_v43, %v449_v42  ;;  %v434_v40 = vld [vmem:[%s5844_s25 + $0x430] sm:$0xff]  ;;  %v451_v42 = vld [vmem:[%s5844_s25 + $0x4b8] sm:$0xff] }
 0x194   : > { %v442_v41 = vld [vmem:[%s5844_s25 + $0x470] sm:$0xff]  ;;  %v459_v43 = vld [vmem:[%s5844_s25 + $0x4f8] sm:$0xff] }
 0x195   : > { %3044 = vmatpush1.bf16.msra.mxu1 %v5086_v50  ;;  %v448_v50 = vld [vmem:[%s5844_s25 + $0x4a0] sm:$0xff] }
 0x196   : > { %3045 = vmatprep.subr.bf16.mxu1 %v5097_v54  ;;  %2510 = vmatpush1.bf16.msra.mxu0 %v5092_v53  ;;  %v315_v53 = vld [vmem:[%s5844_s25 + $0x78] sm:$0xff]  ;;  %v536_v54 = vpack.c.bf16 %v456_v51, %v448_v50 }
 0x197   : > { %2437 = vmatmul.mubr.bf16.gmra.mrb[16].mxu0 %v496_v55  ;;  %2969 = vmatmul.mubr.bf16.gmra.mrb[16].mxu1 %v496_v55  ;;  %v467_v55 = vpack.c.bf16 %v315_v53, %v307_v52  ;;  %v796_v52 = vld [vmem:[#allocation7] sm:$0xf] }
 0x198   : > { %2446 = vmatprep.mubr.bf16.mxu0 %v505_v56  ;;  %2978 = vmatprep.mubr.bf16.mxu1 %v505_v56  ;;  %v306_v56 = vld [vmem:[%s5844_s25 + $0x30] sm:$0xff] }
 0x199   : > { %3046 = vmatpush1.bf16.msra.mxu1 %v5095_v57  ;;  %2511 = vmatprep.subr.bf16.mxu0 %v5100_v58  ;;  %v314_v57 = vld [vmem:[%s5844_s25 + $0x70] sm:$0xff]  ;;  %v323_v58 = vld [vmem:[%s5844_s25 + $0xb8] sm:$0xff] }
 0x19a   : > { %2512 = vmatpush1.bf16.msra.mxu0 %v5098_v59  ;;  %3047 = vmatprep.subr.bf16.mxu1 %v5103_v60  ;;  %v331_v59 = vld [vmem:[%s5844_s25 + $0xf8] sm:$0xff]  ;;  %v466_v60 = vpack.c.bf16 %v314_v57, %v306_v56 }
 0x19b   : > { %2513 = vmatprep.subr.bf16.mxu0 %v5106_v61  ;;  %v475_v61 = vpack.c.bf16 %v331_v59, %v323_v58 }
 0x19d   : > { %3048 = vmatpush1.bf16.msra.mxu1 %v5101_v0  ;;  %v339_v0 = vld [vmem:[%s5844_s25 + $0x138] sm:$0xff] }
 0x19e   : > { %2514 = vmatpush1.bf16.msra.mxu0 %v5104_v3  ;;  %3049 = vmatprep.subr.bf16.mxu1 %v5109_v4  ;;  %v483_v3 = vpack.c.bf16 %v347_v1, %v339_v0  ;;  %v338_v4 = vld [vmem:[%s5844_s25 + $0x130] sm:$0xff] }
 0x19f   : > { %2447 = vmatmul.mubr.bf16.gmra.mrb[20].mxu0 %v504_v5  ;;  %2979 = vmatmul.mubr.bf16.gmra.mrb[20].mxu1 %v504_v5  ;;  %v346_v5 = vld [vmem:[%s5844_s25 + $0x170] sm:$0xff] }
 0x1a0   : > { %2456 = vmatprep.mubr.bf16.mxu0 %v513_v6  ;;  %2988 = vmatprep.mubr.bf16.mxu1 %v513_v6  ;;  %v355_v6 = vld [vmem:[%s5844_s25 + $0x1b8] sm:$0xff] }
 0x1a1   : > { %3050 = vmatpush1.bf16.msra.mxu1 %v5107_v7  ;;  %2515 = vmatprep.subr.bf16.mxu0 %v5112_v8  ;;  %v363_v7 = vld [vmem:[%s5844_s25 + $0x1f8] sm:$0xff]  ;;  %v482_v8 = vpack.c.bf16 %v346_v5, %v338_v4 }
 0x1a2   : > { %2516 = vmatpush1.bf16.msra.mxu0 %v5110_v9  ;;  %3051 = vmatprep.subr.bf16.mxu1 %v5115_v10  ;;  %v491_v9 = vpack.c.bf16 %v363_v7, %v355_v6  ;;  %v354_v10 = vld [vmem:[%s5844_s25 + $0x1b0] sm:$0xff] }
 0x1a3   : > { %2517 = vmatprep.subr.bf16.mxu0 %v5118_v11  ;;  %v362_v11 = vld [vmem:[%s5844_s25 + $0x1f0] sm:$0xff] }
 0x1a4   : > { %v490_v14 = vpack.c.bf16 %v362_v11, %v354_v10 }
 0x1a5   : > { %3052 = vmatpush1.bf16.msra.mxu1 %v5113_v16  ;;  %v370_v16 = vld [vmem:[%s5844_s25 + $0x230] sm:$0xff] }
 0x1a6   : > { %2518 = vmatpush1.bf16.msra.mxu0 %v5116_v17  ;;  %3053 = vmatprep.subr.bf16.mxu1 %v5124_v18  ;;  %v378_v17 = vld [vmem:[%s5844_s25 + $0x270] sm:$0xff]  ;;  %v387_v18 = vld [vmem:[%s5844_s25 + $0x2b8] sm:$0xff] }
 0x1a7   : > { %2457 = vmatmul.mubr.bf16.gmra.mrb[24].mxu0 %v512_v19  ;;  %2989 = vmatmul.mubr.bf16.gmra.mrb[24].mxu1 %v512_v19  ;;  %v395_v19 = vld [vmem:[%s5844_s25 + $0x2f8] sm:$0xff] }
 0x1a8   : > { %2466 = vmatprep.mubr.bf16.mxu0 %v521_v20  ;;  %2998 = vmatprep.mubr.bf16.mxu1 %v521_v20  ;;  %v498_v20 = vpack.c.bf16 %v378_v17, %v370_v16 }
 0x1a9   : > { %2519 = vmatprep.subr.bf16.mxu0 %v5121_v21  ;;  %3054 = vmatpush1.bf16.msra.mxu1 %v5122_v22  ;;  %v507_v21 = vpack.c.bf16 %v395_v19, %v387_v18  ;;  %v386_v22 = vld [vmem:[%s5844_s25 + $0x2b0] sm:$0xff] }
 0x1aa   : > { %2520 = vmatpush1.bf16.msra.mxu0 %v5119_v23  ;;  %3055 = vmatprep.subr.bf16.mxu1 %v5130_v24  ;;  %v394_v23 = vld [vmem:[%s5844_s25 + $0x2f0] sm:$0xff]  ;;  %v403_v24 = vld [vmem:[%s5844_s25 + $0x338] sm:$0xff] }
 0x1ab   : > { %2521 = vmatprep.subr.bf16.mxu0 %v5127_v25  ;;  %v411_v25 = vld [vmem:[%s5844_s25 + $0x378] sm:$0xff]  ;;  %v506_v26 = vpack.c.bf16 %v394_v23, %v386_v22 }
 0x1ac   : > { %v515_v27 = vpack.c.bf16 %v411_v25, %v403_v24 }
 0x1ad   : > { %3056 = vmatpush1.bf16.msra.mxu1 %v5128_v30  ;;  %v419_v30 = vld [vmem:[%s5844_s25 + $0x3b8] sm:$0xff] }
 0x1ae   : > { %2522 = vmatpush1.bf16.msra.mxu0 %v5125_v31  ;;  %3057 = vmatprep.subr.bf16.mxu1 %v5136_v32  ;;  %v427_v31 = vld [vmem:[%s5844_s25 + $0x3f8] sm:$0xff]  ;;  %v514_v32 = vpack.c.bf16 %v410_v29, %v402_v28 }
 0x1af   : > { %2467 = vmatmul.mubr.bf16.gmra.mrb[28].mxu0 %v520_v33  ;;  %2999 = vmatmul.mubr.bf16.gmra.mrb[28].mxu1 %v520_v33  ;;  %v523_v33 = vpack.c.bf16 %v427_v31, %v419_v30 }
 0x1b0   : > { %2476 = vmatprep.mubr.bf16.mxu0 %v529_v34  ;;  %3008 = vmatprep.mubr.bf16.mxu1 %v529_v34  ;;  %v418_v34 = vld [vmem:[%s5844_s25 + $0x3b0] sm:$0xff] }
 0x1b1   : > { %2523 = vmatprep.subr.bf16.mxu0 %v5133_v35  ;;  %3058 = vmatpush1.bf16.msra.mxu1 %v5134_v36  ;;  %v426_v35 = vld [vmem:[%s5844_s25 + $0x3f0] sm:$0xff]  ;;  %v435_v36 = vld [vmem:[%s5844_s25 + $0x438] sm:$0xff] }
 0x1b2   : > { %2524 = vmatpush1.bf16.msra.mxu0 %v5131_v37  ;;  %3059 = vmatprep.subr.bf16.mxu1 %v5142_v38  ;;  %v443_v37 = vld [vmem:[%s5844_s25 + $0x478] sm:$0xff]  ;;  %v522_v38 = vpack.c.bf16 %v426_v35, %v418_v34 }
 0x1b3   : > { %2525 = vmatprep.subr.bf16.mxu0 %v5139_v39  ;;  %v531_v39 = vpack.c.bf16 %v443_v37, %v435_v36 }
 0x1b5   : > { %3060 = vmatpush1.bf16.msra.mxu1 %v5140_v44  ;;  %v530_v44 = vpack.c.bf16 %v442_v41, %v434_v40 }
 0x1b6   : > { %2526 = vmatpush1.bf16.msra.mxu0 %v5137_v45  ;;  %v539_v45 = vpack.c.bf16 %v459_v43, %v451_v42 }
 0x1b7   : > { %2477 = vmatmul.mubr.bf16.gmra.mrb[32].mxu0 %v528_v46  ;;  %3009 = vmatmul.mubr.bf16.gmra.mrb[32].mxu1 %v528_v46  ;;  %v450_v46 = vld [vmem:[%s5844_s25 + $0x4b0] sm:$0xff] }
 0x1b8   : > { %2486 = vmatprep.mubr.bf16.mxu0 %v537_v47  ;;  %3018 = vmatprep.mubr.bf16.mxu1 %v537_v47  ;;  %v458_v47 = vld [vmem:[%s5844_s25 + $0x4f0] sm:$0xff] }
 0x1b9   : > { %2527 = vmatprep.subr.bf16.mxu0 %v5145_v48  ;;  %v538_v48 = vpack.c.bf16 %v458_v47, %v450_v46 }
 0x1ba   : > { %2528 = vmatpush1.bf16.msra.mxu0 %v5143_v49  ;;  %v798_v49 = vlaneseq }
 0x1bc   : > { %v6018_v50 = vshrl.u32 %v798_v49, 7 }
 0x1be   : > { %v808_v51 = vsub.s32 2, %v6018_v50  ;;  %v812_v53 = vsub.s32 3, %v6018_v50  ;;  %v804_v57 = vsub.s32 1, %v6018_v50 }
 0x1bf   : > { %2487 = vmatmul.mubr.bf16.gmra.mrb[36].mxu0 %v536_v54  ;;  %3019 = vmatmul.mubr.bf16.gmra.mrb[36].mxu1 %v536_v54  ;;  %v800_v54 = vsub.s32 0, %v6018_v50 }
 0x1c0   : > { %2529 = vmatprep.mubr.bf16.mxu0 %v467_v55  ;;  %3061 = vmatprep.mubr.bf16.mxu1 %v467_v55  ;;  %v6023_v55 = vrot.slane %v796_v52, %v808_v51  ;;  %v6025_v56 = vrot.slane %v796_v52, %v812_v53  ;;  %v6036_v4 = vrot.slane %v796_v52, %v804_v57 }
 0x1c7   : > { %2530 = vmatmul.mubr.bf16.vlgmr.msra.gmra.mrb[0].mxu0 %v466_v60  ;;  %3062 = vmatmul.mubr.bf16.vlgmr.msra.gmra.mrb[0].mxu1 %v466_v60  ;;  %v6030_v60 = vrot.slane %v796_v52, %v800_v54 }
 0x1c8   : > { %2539 = vmatprep.mubr.bf16.mxu0 %v475_v61  ;;  %3071 = vmatprep.mubr.bf16.mxu1 %v475_v61 }
 0x1cf   : > { %2540 = vmatmul.mubr.bf16.gmra.mrb[4].mxu0 %v474_v2  ;;  %3072 = vmatmul.mubr.bf16.gmra.mrb[4].mxu1 %v474_v2 }
 0x1d0   : > { %2549 = vmatprep.mubr.bf16.mxu0 %v483_v3  ;;  %3081 = vmatprep.mubr.bf16.mxu1 %v483_v3 }
 0x1d7   : > { %2550 = vmatmul.mubr.bf16.gmra.mrb[8].mxu0 %v482_v8  ;;  %3082 = vmatmul.mubr.bf16.gmra.mrb[8].mxu1 %v482_v8 }
 0x1d8   : > { %2559 = vmatprep.mubr.bf16.mxu0 %v491_v9  ;;  %3091 = vmatprep.mubr.bf16.mxu1 %v491_v9 }
 0x1df   : > { %2560 = vmatmul.mubr.bf16.gmra.mrb[12].mxu0 %v490_v14  ;;  %3092 = vmatmul.mubr.bf16.gmra.mrb[12].mxu1 %v490_v14 }
 0x1e0   : > { %2569 = vmatprep.mubr.bf16.mxu0 %v499_v15  ;;  %3101 = vmatprep.mubr.bf16.mxu1 %v499_v15 }
 0x1e7   : > { %2570 = vmatmul.mubr.bf16.gmra.mrb[16].mxu0 %v498_v20  ;;  %3102 = vmatmul.mubr.bf16.gmra.mrb[16].mxu1 %v498_v20 }
 0x1e8   : > { %2579 = vmatprep.mubr.bf16.mxu0 %v507_v21  ;;  %3111 = vmatprep.mubr.bf16.mxu1 %v507_v21 }
 0x1ef   : > { %2580 = vmatmul.mubr.bf16.gmra.mrb[20].mxu0 %v506_v26  ;;  %3112 = vmatmul.mubr.bf16.gmra.mrb[20].mxu1 %v506_v26 }
 0x1f0   : > { %2589 = vmatprep.mubr.bf16.mxu0 %v515_v27  ;;  %3121 = vmatprep.mubr.bf16.mxu1 %v515_v27 }
 0x1f7   : > { %2590 = vmatmul.mubr.bf16.gmra.mrb[24].mxu0 %v514_v32  ;;  %3122 = vmatmul.mubr.bf16.gmra.mrb[24].mxu1 %v514_v32 }
 0x1f8   : > { %2599 = vmatprep.mubr.bf16.mxu0 %v523_v33  ;;  %3131 = vmatprep.mubr.bf16.mxu1 %v523_v33 }
 0x1ff   : > { %2600 = vmatmul.mubr.bf16.gmra.mrb[28].mxu0 %v522_v38  ;;  %3132 = vmatmul.mubr.bf16.gmra.mrb[28].mxu1 %v522_v38 }
 0x200   : > { %2609 = vmatprep.mubr.bf16.mxu0 %v531_v39  ;;  %3141 = vmatprep.mubr.bf16.mxu1 %v531_v39 }
 0x207   : > { %2610 = vmatmul.mubr.bf16.gmra.mrb[32].mxu0 %v530_v44  ;;  %3142 = vmatmul.mubr.bf16.gmra.mrb[32].mxu1 %v530_v44 }
 0x208   : > { %2619 = vmatprep.mubr.bf16.mxu0 %v539_v45  ;;  %3151 = vmatprep.mubr.bf16.mxu1 %v539_v45 }
 0x20f   : > { %2620 = vmatmul.mubr.bf16.gmra.mrb[36].mxu0 %v538_v48  ;;  %3152 = vmatmul.mubr.bf16.gmra.mrb[36].mxu1 %v538_v48 }
 0x29a   : > { %v2531_v58 = vpop.f32.mrb[0].mxu0  ;;  %v3063_v59 = vpop.f32.mrb[0].mxu1 }
 0x29b   : > { %v4346_v61 = vadd.f32 %v3063_v59, %v6023_v55  ;;  %v2533_v62 = vpop.f32.mrb[1].mxu0  ;;  %v3065_v63 = vpop.f32.mrb[1].mxu1  ;;  %v4306_v10 = vadd.f32 %v2531_v58, %v6030_v60 }
 0x29c   : > { %v4347_v0 = vadd.f32 %v3065_v63, %v6025_v56  ;;  %v2535_v1 = vpop.f32.mrb[2].mxu0  ;;  %v3067_v2 = vpop.f32.mrb[2].mxu1  ;;  %v4307_v13 = vadd.f32 %v2533_v62, %v6036_v4 }
 0x29d   : > { %v4248_v3 = vmul.f32 -1.442695, %v4346_v61  ;;  %v4348_v5 = vadd.f32 %v3067_v2, %v6023_v55  ;;  %v2537_v6 = vpop.f32.mrb[3].mxu0  ;;  %v3069_v7 = vpop.f32.mrb[3].mxu1  ;;  %v4308_v14 = vadd.f32 %v2535_v1, %v6030_v60  ;;  %v3482_v1 = vld [vmem:[#allocation8] sm:$0x3] }
 0x29e   : > { %v4249_v8 = vmul.f32 -1.442695, %v4347_v0  ;;  %v4349_v9 = vadd.f32 %v3069_v7, %v6025_v56  ;;  %v4309_v23 = vadd.f32 %v2537_v6, %v6036_v4 }
 0x29f   : > { %5146 = vpow2.f32 %v4248_v3  ;;  %v4250_v11 = vmul.f32 -1.442695, %v4348_v5 }
 0x2a0   : > { %5148 = vpow2.f32 %v4249_v8  ;;  %v4251_v12 = vmul.f32 -1.442695, %v4349_v9 }
 0x2a1   : > { %5150 = vpow2.f32 %v4250_v11 }
 0x2a2   : > { %v2541_v15 = vpop.f32.mrb[4].mxu0  ;;  %v3073_v16 = vpop.f32.mrb[4].mxu1  ;;  %5152 = vtanh.f32 %v4306_v10 }
 0x2a3   : > { %v4350_v17 = vadd.f32 %v3073_v16, %v6023_v55  ;;  %v2543_v18 = vpop.f32.mrb[5].mxu0  ;;  %v3075_v19 = vpop.f32.mrb[5].mxu1  ;;  %5154 = vpow2.f32 %v4251_v12  ;;  %v4310_v30 = vadd.f32 %v2541_v15, %v6030_v60 }
 0x2a4   : > { %v4351_v20 = vadd.f32 %v3075_v19, %v6025_v56  ;;  %v2545_v21 = vpop.f32.mrb[6].mxu0  ;;  %v3077_v22 = vpop.f32.mrb[6].mxu1  ;;  %5156 = vtanh.f32 %v4307_v13  ;;  %v4311_v43 = vadd.f32 %v2543_v18, %v6036_v4 }
 0x2a5   : > { %v4252_v24 = vmul.f32 -1.442695, %v4350_v17  ;;  %v4352_v25 = vadd.f32 %v3077_v22, %v6023_v55  ;;  %v6047_v26 = vpop.f32.mrb[7].mxu0  ;;  %v3079_v27 = vpop.f32.mrb[7].mxu1  ;;  %5158 = vtanh.f32 %v4308_v14  ;;  %v4312_v61 = vadd.f32 %v2545_v21, %v6030_v60 }
 0x2a6   : > { %v4253_v28 = vmul.f32 -1.442695, %v4351_v20  ;;  %v4353_v29 = vadd.f32 %v3079_v27, %v6025_v56  ;;  %v6077_v21 = vrot.slane %v3482_v1, %v800_v54 }
 0x2a7   : > { %5160 = vpow2.f32 %v4252_v24  ;;  %v4254_v31 = vmul.f32 -1.442695, %v4352_v25  ;;  %v6084_v25 = vrot.slane %v3482_v1, %v804_v57 }
 0x2a8   : > { %5162 = vpow2.f32 %v4253_v28  ;;  %v4255_v35 = vmul.f32 -1.442695, %v4353_v29 }
 0x2a9   : > { %v5147_v32 = vpop.eup %5146  ;;  %5164 = vtanh.f32 %v4309_v23  ;;  %v4313_v23 = vadd.f32 %v6047_v26, %v6036_v4 }
 0x2aa   : > { %v5149_v33 = vpop.eup %5148  ;;  %v3322_v34 = vadd.f32 1.0, %v5147_v32  ;;  %5166 = vpow2.f32 %v4254_v31  ;;  %v6051_v36 = vpop.f32.mrb[8].mxu0 }
 0x2ab   : > { %v3083_v37 = vpop.f32.mrb[8].mxu1  ;;  %v3323_v38 = vadd.f32 1.0, %v5149_v33  ;;  %5168 = vtanh.f32 %v4310_v30  ;;  %v6054_v40 = vpop.f32.mrb[9].mxu0  ;;  %v4314_v30 = vadd.f32 %v6051_v36, %v6030_v60 }
 0x2ac   : > { %v4354_v39 = vadd.f32 %v3083_v37, %v6023_v55  ;;  %v3085_v41 = vpop.f32.mrb[9].mxu1  ;;  %v5151_v42 = vpop.eup %5150  ;;  %5170 = vrcp.f32 %v3322_v34 }
 0x2ad   : > { %v6057_v44 = vpop.f32.mrb[10].mxu0  ;;  %v3087_v45 = vpop.f32.mrb[10].mxu1  ;;  %5172 = vrcp.f32 %v3323_v38  ;;  %v3324_v47 = vadd.f32 1.0, %v5151_v42  ;;  %v4355_v53 = vadd.f32 %v3085_v41, %v6025_v56 }
 0x2ae   : > { %v5153_v46 = vpop.eup %5152  ;;  %v6059_v48 = vpop.f32.mrb[11].mxu0  ;;  %5174 = vpow2.f32 %v4255_v35  ;;  %v4256_v52 = vmul.f32 -1.442695, %v4354_v39  ;;  %v4356_v0 = vadd.f32 %v3087_v45, %v6023_v55  ;;  %v4315_v45 = vadd.f32 %v6054_v40, %v6036_v4 }
 0x2af   : > { %v3089_v49 = vpop.f32.mrb[11].mxu1  ;;  %v5155_v51 = vpop.eup %5154  ;;  %5176 = vrcp.f32 %v3324_v47  ;;  %v4257_v5 = vmul.f32 -1.442695, %v4355_v53 }
 0x2b0   : > { %v5157_v58 = vpop.eup %5156  ;;  %v3325_v59 = vadd.f32 1.0, %v5155_v51  ;;  %5178 = vtanh.f32 %v4311_v43  ;;  %v4357_v13 = vadd.f32 %v3089_v49, %v6025_v56  ;;  %v4258_v18 = vmul.f32 -1.442695, %v4356_v0 }
 0x2b1   : > { %v5159_v62 = vpop.eup %5158 }
 0x2b2   : > { %v5161_v63 = vpop.eup %5160  ;;  %5180 = vrcp.f32 %v3325_v59  ;;  %v6064_v6 = vpop.f32.mrb[12].mxu0  ;;  %v4259_v54 = vmul.f32 -1.442695, %v4357_v13 }
 0x2b3   : > { %v5163_v2 = vpop.eup %5162  ;;  %v3326_v3 = vadd.f32 1.0, %v5161_v63  ;;  %5182 = vpow2.f32 %v4256_v52  ;;  %v3093_v7 = vpop.f32.mrb[12].mxu1  ;;  %v4316_v63 = vadd.f32 %v6057_v44, %v6030_v60  ;;  %v4317_v44 = vadd.f32 %v6059_v48, %v6036_v4 }
 0x2b4   : > { %v6066_v8 = vpop.eup %5164  ;;  %v3327_v9 = vadd.f32 1.0, %v5163_v2  ;;  %5184 = vtanh.f32 %v4312_v61  ;;  %v6068_v10 = vpop.f32.mrb[13].mxu0  ;;  %v4358_v24 = vadd.f32 %v3093_v7, %v6023_v55 }
 0x2b5   : > { %v3095_v11 = vpop.f32.mrb[13].mxu1  ;;  %v5167_v12 = vpop.eup %5166  ;;  %5186 = vrcp.f32 %v3326_v3 }
 0x2b6   : > { %v6071_v14 = vpop.f32.mrb[14].mxu0  ;;  %v3097_v15 = vpop.f32.mrb[14].mxu1  ;;  %5188 = vrcp.f32 %v3327_v9  ;;  %v3328_v17 = vadd.f32 1.0, %v5167_v12  ;;  %v4359_v26 = vadd.f32 %v3095_v11, %v6025_v56  ;;  %v4260_v50 = vmul.f32 -1.442695, %v4358_v24 }
 0x2b7   : > { %v5169_v16 = vpop.eup %5168  ;;  %v6073_v19 = vpop.f32.mrb[15].mxu0  ;;  %5190 = vpow2.f32 %v4257_v5 }
 0x2b8   : > { %v3099_v20 = vpop.f32.mrb[15].mxu1  ;;  %v5171_v22 = vpop.eup %5170  ;;  %5192 = vrcp.f32 %v3328_v17 }
 0x2b9   : > { %v5173_v27 = vpop.eup %5172  ;;  %v3442_v28 = vmul.f32 %v5171_v22, %v5153_v46  ;;  %5194 = vpow2.f32 %v4258_v18  ;;  %v4360_v46 = vadd.f32 %v3097_v15, %v6023_v55  ;;  %v4361_v40 = vadd.f32 %v3099_v20, %v6025_v56 }
 0x2ba   : > { %v5175_v29 = vpop.eup %5174  ;;  %v3443_v31 = vmul.f32 %v5173_v27, %v5157_v58  ;;  %5196 = vtanh.f32 %v4313_v23  ;;  %v6090_v57 = vpop.f32.mrb[16].mxu0  ;;  %v4261_v58 = vmul.f32 -1.442695, %v4359_v26 }
 0x2bb   : > { %v5177_v32 = vpop.eup %5176  ;;  %v3329_v33 = vadd.f32 1.0, %v5175_v29  ;;  %v3494_v34 = vmul.f32 %v6077_v21, %v3442_v28  ;;  %v3103_v37 = vpop.f32.mrb[16].mxu1  ;;  %v4262_v5 = vmul.f32 -1.442695, %v4360_v46  ;;  %v4263_v15 = vmul.f32 -1.442695, %v4361_v40 }
 0x2bc   : > { %v5179_v35 = vpop.eup %5178  ;;  %v3495_v38 = vmul.f32 %v6084_v25, %v3443_v31  ;;  %v3444_v39 = vmul.f32 %v5177_v32, %v5159_v62  ;;  %v6093_v36 = vpop.f32.mrb[17].mxu0  ;;  %v4362_v17 = vadd.f32 %v3103_v37, %v6023_v55 }
 0x2bd   : > { %v5181_v41 = vpop.eup %5180  ;;  %5198 = vrcp.f32 %v3329_v33  ;;  %v3105_v42 = vpop.f32.mrb[17].mxu1 }
 0x2be   : > { %v5183_v43 = vpop.eup %5182  ;;  %5200 = vpow2.f32 %v4259_v54  ;;  %v6098_v47 = vpop.f32.mrb[18].mxu0  ;;  %v3534_v51 = vadd.f32 %v3495_v38, %v3494_v34  ;;  %v3445_v1 = vmul.f32 %v5181_v41, %v6066_v8  ;;  %v3496_v2 = vmul.f32 %v6077_v21, %v3444_v39 }
 0x2bf   : > { %v3107_v49 = vpop.f32.mrb[18].mxu1  ;;  %v5185_v52 = vpop.eup %5184  ;;  %5202 = vtanh.f32 %v4314_v30  ;;  %v3330_v53 = vadd.f32 1.0, %v5183_v43  ;;  %v4318_v30 = vadd.f32 %v6064_v6, %v6030_v60  ;;  %v4363_v33 = vadd.f32 %v3105_v42, %v6025_v56 }
 0x2c0   : > { %v6100_v59 = vpop.f32.mrb[19].mxu0  ;;  %v6102_v61 = vpop.f32.mrb[19].mxu1  ;;  %5204 = vpow2.f32 %v4260_v50  ;;  %3535 = vadd.xlane.f32.xlu0 %v3534_v51  ;;  %v3497_v13 = vmul.f32 %v6084_v25, %v3445_v1  ;;  %v4264_v50 = vmul.f32 -1.442695, %v4362_v17  ;;  %v4319_v6 = vadd.f32 %v6068_v10, %v6036_v4 }
 0x2c1   : > { %v5187_v62 = vpop.eup %5186  ;;  %5206 = vrcp.f32 %v3330_v53  ;;  %v4364_v43 = vadd.f32 %v3107_v49, %v6023_v55  ;;  %v4320_v49 = vadd.f32 %v6071_v14, %v6030_v60 }
 0x2c2   : > { %v5189_v0 = vpop.eup %5188  ;;  %5208 = vtanh.f32 %v4315_v45  ;;  %v3446_v7 = vmul.f32 %v5187_v62, %v5169_v16  ;;  %v6113_v8 = vpop.f32.mrb[20].mxu0  ;;  %v3537_v16 = vadd.f32 %v3497_v13, %v3496_v2 }
 0x2c3   : > { %v5191_v3 = vpop.eup %5190  ;;  %v3447_v9 = vmul.f32 %v5189_v0, %v5179_v35  ;;  %5210 = vpow2.f32 %v4261_v58  ;;  %v6115_v18 = vpop.f32.mrb[20].mxu1  ;;  %v4365_v0 = vadd.f32 %v6102_v61, %v6025_v56 }
 0x2c4   : > { %v5193_v11 = vpop.eup %5192  ;;  %v3331_v12 = vadd.f32 1.0, %v5191_v3  ;;  %5212 = vtanh.f32 %v4316_v63  ;;  %v6117_v23 = vpop.f32.mrb[21].mxu0  ;;  %v3498_v48 = vmul.f32 %v6077_v21, %v3446_v7  ;;  %3538 = vadd.xlane.f32.xlu0 %v3537_v16  ;;  %v4266_v7 = vmul.f32 -1.442695, %v4364_v43 }
 0x2c5   : > { %v3448_v20 = vmul.f32 %v5193_v11, %v5185_v52  ;;  %v5195_v22 = vpop.eup %5194  ;;  %v6119_v24 = vpop.f32.mrb[21].mxu1  ;;  %v3499_v27 = vmul.f32 %v6084_v25, %v3447_v9  ;;  %v4265_v52 = vmul.f32 -1.442695, %v4363_v33  ;;  %v4366_v17 = vadd.f32 %v6115_v18, %v6023_v55 }
 0x2c6   : > { %5214 = vrcp.f32 %v3331_v12  ;;  %v5197_v28 = vpop.eup %5196  ;;  %v3332_v29 = vadd.f32 1.0, %v5195_v22  ;;  %v6125_v54 = vpop.f32.mrb[22].mxu0  ;;  %v4267_v16 = vmul.f32 -1.442695, %v4365_v0 }
 0x2c7   : > { %5216 = vpow2.f32 %v4262_v5  ;;  %v6127_v31 = vpop.f32.mrb[22].mxu1  ;;  %v5199_v32 = vpop.eup %5198  ;;  %v3540_v39 = vadd.f32 %v3499_v27, %v3498_v48  ;;  %v3500_v45 = vmul.f32 %v6077_v21, %v3448_v20 }
 0x2c8   : > { %5218 = vtanh.f32 %v4317_v44  ;;  %v6130_v26 = vpop.f32.mrb[23].mxu0  ;;  %v6132_v34 = vpop.f32.mrb[23].mxu1  ;;  %v3449_v42 = vmul.f32 %v5199_v32, %v5197_v28  ;;  %v4322_v28 = vadd.f32 %v6090_v57, %v6030_v60 }
 0x2c9   : > { %v5201_v35 = vpop.eup %5200  ;;  %5220 = vrcp.f32 %v3332_v29  ;;  %3541 = vadd.xlane.f32.xlu1 %v3540_v39 }
 0x2ca   : > { %v5203_v37 = vpop.eup %5202  ;;  %v3333_v38 = vadd.f32 1.0, %v5201_v35  ;;  %5222 = vpow2.f32 %v4263_v15  ;;  %v6138_v58 = vpop.f32.mrb[24].mxu0  ;;  %v3501_v10 = vmul.f32 %v6084_v25, %v3449_v42  ;;  %v4321_v15 = vadd.f32 %v6073_v19, %v6036_v4 }
 0x2cb   : > { %v5205_v41 = vpop.eup %5204  ;;  %5224 = vtanh.f32 %v4318_v30  ;;  %v6140_v62 = vpop.f32.mrb[24].mxu1  ;;  %v4367_v19 = vadd.f32 %v6119_v24, %v6025_v56  ;;  %v4368_v42 = vadd.f32 %v6127_v31, %v6023_v55  ;;  %v4369_v31 = vadd.f32 %v6132_v34, %v6025_v56 }
 0x2cc   : > { %v5207_v46 = vpop.eup %5206  ;;  %5226 = vrcp.f32 %v3333_v38  ;;  %v3334_v51 = vadd.f32 1.0, %v5205_v41  ;;  %v6147_v1 = vpop.f32.mrb[25].mxu0  ;;  %v3543_v9 = vadd.f32 %v3501_v10, %v3500_v45  ;;  %v4325_v34 = vadd.f32 %v6100_v59, %v6036_v4 }
 0x2cd   : > { %v5209_v53 = vpop.eup %5208  ;;  %5228 = vpow2.f32 %v4264_v50  ;;  %v3450_v63 = vmul.f32 %v5207_v46, %v5203_v37  ;;  %v6149_v2 = vpop.f32.mrb[25].mxu1  ;;  %v4268_v50 = vmul.f32 -1.442695, %v4366_v17  ;;  %v4269_v10 = vmul.f32 -1.442695, %v4367_v19 }
 0x2ce   : > { %v5211_v40 = vpop.eup %5210  ;;  %5230 = vtanh.f32 %v4319_v6  ;;  %v6151_v11 = vpop.f32.mrb[26].mxu0  ;;  %3544 = vadd.xlane.f32.xlu1 %v3543_v9  ;;  %v4323_v6 = vadd.f32 %v6093_v36, %v6036_v4 }
 0x2cf   : > { %v5213_v3 = vpop.eup %5212  ;;  %5232 = vrcp.f32 %v3334_v51  ;;  %v3335_v5 = vadd.f32 1.0, %v5211_v40  ;;  %v6153_v12 = vpop.f32.mrb[26].mxu1  ;;  %v3502_v29 = vmul.f32 %v6077_v21, %v3450_v63 }
 0x2d0   : > { %v5215_v44 = vpop.eup %5214  ;;  %5234 = vpow2.f32 %v4265_v52  ;;  %v6155_v13 = vpop.f32.mrb[27].mxu0 }
 0x2d1   : > { %v6157_v14 = vpop.f32.mrb[27].mxu1  ;;  %v5217_v61 = vpop.eup %5216  ;;  %5236 = vrcp.f32 %v3335_v5  ;;  %v3451_v48 = vmul.f32 %v5215_v44, %v5209_v53  ;;  %v4324_v5 = vadd.f32 %v6098_v47, %v6030_v60  ;;  %v4270_v44 = vmul.f32 -1.442695, %v4368_v42 }
 0x2d2   : > { %v5219_v20 = vpop.eup %5218  ;;  %5238 = vtanh.f32 %v4320_v49  ;;  %v3336_v22 = vadd.f32 1.0, %v5217_v61  ;;  %v6169_v37 = vpop.f32.mrb[28].mxu0 }
 0x2d3   : > { %v5221_v27 = vpop.eup %5220  ;;  %5240 = vpow2.f32 %v4266_v7  ;;  %v3503_v18 = vmul.f32 %v6084_v25, %v3451_v48  ;;  %v6171_v38 = vpop.f32.mrb[28].mxu1  ;;  %v4370_v48 = vadd.f32 %v6140_v62, %v6023_v55 }
 0x2d4   : > { %v5223_v30 = vpop.eup %5222  ;;  %5242 = vrcp.f32 %v3336_v22  ;;  %v3452_v32 = vmul.f32 %v5221_v27, %v5213_v3  ;;  %v6175_v41 = vpop.f32.mrb[29].mxu0 }
 0x2d5   : > { %v5225_v33 = vpop.eup %5224  ;;  %5244 = vtanh.f32 %v4321_v15  ;;  %v3337_v35 = vadd.f32 1.0, %v5223_v30  ;;  %v3546_v39 = vadd.f32 %v3503_v18, %v3502_v29  ;;  %v6177_v24 = vpop.f32.mrb[29].mxu1 }
 0x2d6   : > { %v5227_v57 = vpop.eup %5226  ;;  %5246 = vpow2.f32 %v4267_v16  ;;  %v3504_v46 = vmul.f32 %v6077_v21, %v3452_v32  ;;  %v6182_v51 = vpop.f32.mrb[30].mxu0  ;;  %v4271_v16 = vmul.f32 -1.442695, %v4369_v31 }
 0x2d7   : > { %v5229_v43 = vpop.eup %5228  ;;  %5248 = vrcp.f32 %v3337_v35  ;;  %v3453_v45 = vmul.f32 %v5227_v57, %v5219_v20  ;;  %v6184_v52 = vpop.f32.mrb[30].mxu1  ;;  %3547 = vadd.xlane.f32.xlu0 %v3546_v39  ;;  %v4326_v57 = vadd.f32 %v6113_v8, %v6030_v60  ;;  %v4327_v8 = vadd.f32 %v6117_v23, %v6036_v4 }
 0x2d8   : > { %v5231_v53 = vpop.eup %5230  ;;  %5250 = vtanh.f32 %v4322_v28  ;;  %v3338_v36 = vadd.f32 1.0, %v5229_v43  ;;  %v6186_v63 = vpop.f32.mrb[31].mxu0  ;;  %v4328_v23 = vadd.f32 %v6125_v54, %v6030_v60 }
 0x2d9   : > { %v6188_v40 = vpop.f32.mrb[31].mxu1  ;;  %v5233_v49 = vpop.eup %5232  ;;  %5252 = vpow2.f32 %v4268_v50  ;;  %v3505_v0 = vmul.f32 %v6084_v25, %v3453_v45 }
 0x2da   : > { %v5235_v3 = vpop.eup %5234  ;;  %5254 = vrcp.f32 %v3338_v36  ;;  %v3454_v17 = vmul.f32 %v5233_v49, %v5225_v33  ;;  %v6199_v47 = vpop.f32.mrb[32].mxu0 }
 0x2db   : > { %v5237_v7 = vpop.eup %5236  ;;  %5256 = vtanh.f32 %v4323_v6  ;;  %v3339_v9 = vadd.f32 1.0, %v5235_v3  ;;  %v3549_v61 = vadd.f32 %v3505_v0, %v3504_v46  ;;  %v6201_v27 = vpop.f32.mrb[32].mxu1  ;;  %v4371_v6 = vadd.f32 %v6149_v2, %v6025_v56 }
 0x2dc   : > { %v5239_v15 = vpop.eup %5238  ;;  %5258 = vpow2.f32 %v4269_v10  ;;  %v3455_v20 = vmul.f32 %v5237_v7, %v5231_v53  ;;  %v3506_v30 = vmul.f32 %v6077_v21, %v3454_v17  ;;  %v6205_v18 = vpop.f32.mrb[33].mxu0  ;;  %v4272_v53 = vmul.f32 -1.442695, %v4370_v48 }
 0x2dd   : > { %v5241_v22 = vpop.eup %5240  ;;  %5260 = vrcp.f32 %v3339_v9  ;;  %3550 = vadd.xlane.f32.xlu1 %v3549_v61  ;;  %v6207_v32 = vpop.f32.mrb[33].mxu1  ;;  %v4372_v2 = vadd.f32 %v6153_v12, %v6023_v55  ;;  %v4373_v12 = vadd.f32 %v6157_v14, %v6025_v56 }
 0x2de   : > { %v5243_v28 = vpop.eup %5242  ;;  %5262 = vtanh.f32 %v4324_v5  ;;  %v3340_v29 = vadd.f32 1.0, %v5241_v22  ;;  %v3507_v19 = vmul.f32 %v6084_v25, %v3455_v20  ;;  %v6209_v62 = vpop.f32.mrb[34].mxu0  ;;  %v4273_v5 = vmul.f32 -1.442695, %v4371_v6 }
 0x2df   : > { %v5245_v59 = vpop.eup %5244  ;;  %5264 = vpow2.f32 %v4270_v44  ;;  %v3456_v33 = vmul.f32 %v5243_v28, %v5239_v15  ;;  %v6211_v35 = vpop.f32.mrb[34].mxu1  ;;  %v4274_v28 = vmul.f32 -1.442695, %v4372_v2  ;;  %v4374_v6 = vadd.f32 %v6171_v38, %v6023_v55 }
 0x2e0   : > { %v5247_v50 = vpop.eup %5246  ;;  %5266 = vrcp.f32 %v3340_v29  ;;  %v3552_v39 = vadd.f32 %v3507_v19, %v3506_v30  ;;  %v6217_v43 = vpop.f32.mrb[35].mxu0 }
 0x2e1   : > { %v6219_v42 = vpop.f32.mrb[35].mxu1  ;;  %v5249_v45 = vpop.eup %5248  ;;  %5268 = vtanh.f32 %v4325_v34  ;;  %v3341_v46 = vadd.f32 1.0, %v5247_v50  ;;  %v3508_v49 = vmul.f32 %v6077_v21, %v3456_v33 }
 0x2e2   : > { %v5251_v36 = vpop.eup %5250  ;;  %5270 = vpow2.f32 %v4271_v16  ;;  %3553 = vadd.xlane.f32.xlu0 %v3552_v39  ;;  %v3457_v10 = vmul.f32 %v5249_v45, %v5245_v59  ;;  %v6227_v61 = vpop.f32.mrb[36].mxu0 }
 0x2e3   : > { %v5253_v31 = vpop.eup %5252  ;;  %5272 = vrcp.f32 %v3341_v46  ;;  %v6229_v15 = vpop.f32.mrb[36].mxu1  ;;  %v4275_v46 = vmul.f32 -1.442695, %v4373_v12 }
 0x2e4   : > { %v5255_v0 = vpop.eup %5254  ;;  %5274 = vtanh.f32 %v4326_v57  ;;  %v3342_v3 = vadd.f32 1.0, %v5253_v31  ;;  %v3509_v7 = vmul.f32 %v6084_v25, %v3457_v10  ;;  %v6235_v22 = vpop.f32.mrb[37].mxu0  ;;  %v4329_v57 = vadd.f32 %v6130_v26, %v6036_v4 }
 0x2e5   : > { %v5257_v9 = vpop.eup %5256  ;;  %5276 = vpow2.f32 %v4272_v53  ;;  %v3458_v44 = vmul.f32 %v5255_v0, %v5251_v36  ;;  %v6237_v34 = vpop.f32.mrb[37].mxu1  ;;  %v4330_v31 = vadd.f32 %v6138_v58, %v6030_v60  ;;  %v4375_v26 = vadd.f32 %v6177_v24, %v6025_v56 }
 0x2e6   : > { %v5259_v17 = vpop.eup %5258  ;;  %5278 = vrcp.f32 %v3342_v3  ;;  %v3555_v20 = vadd.f32 %v3509_v7, %v3508_v49  ;;  %v6239_v29 = vpop.f32.mrb[38].mxu0  ;;  %v4276_v0 = vmul.f32 -1.442695, %v4374_v6  ;;  %v4376_v58 = vadd.f32 %v6184_v52, %v6023_v55 }
 0x2e7   : > { %v5261_v16 = vpop.eup %5260  ;;  %5280 = vtanh.f32 %v4327_v8  ;;  %v3343_v48 = vadd.f32 1.0, %v5259_v17  ;;  %v6241_v30 = vpop.f32.mrb[38].mxu1  ;;  %v3510_v59 = vmul.f32 %v6077_v21, %v3458_v44  ;;  %v4331_v44 = vadd.f32 %v6147_v1, %v6036_v4 }
 0x2e8   : > { %v5263_v19 = vpop.eup %5262  ;;  %5282 = vpow2.f32 %v4273_v5  ;;  %3556 = vadd.xlane.f32.xlu1 %v3555_v20  ;;  %v3459_v54 = vmul.f32 %v5261_v16, %v5257_v9  ;;  %v6244_v14 = vpop.f32.mrb[39].mxu0  ;;  %v4377_v1 = vadd.f32 %v6188_v40, %v6025_v56 }
 0x2e9   : > { %v6246_v33 = vpop.f32.mrb[39].mxu1  ;;  %v5265_v50 = vpop.eup %5264  ;;  %5284 = vrcp.f32 %v3343_v48 }
 0x2ea   : > { %v5267_v39 = vpop.eup %5266  ;;  %5286 = vtanh.f32 %v4328_v23  ;;  %v3344_v45 = vadd.f32 1.0, %v5265_v50  ;;  %v3511_v53 = vmul.f32 %v6084_v25, %v3459_v54  ;;  %v4277_v23 = vmul.f32 -1.442695, %v4375_v26 }
 0x2eb   : > { %v5269_v36 = vpop.eup %5268  ;;  %5288 = vpow2.f32 %v4274_v28  ;;  %v3460_v10 = vmul.f32 %v5267_v39, %v5263_v19  ;;  %v4332_v28 = vadd.f32 %v6151_v11, %v6030_v60  ;;  %v4378_v11 = vadd.f32 %v6201_v27, %v6023_v55 }
 0x2ec   : > { %v5271_v49 = vpop.eup %5270  ;;  %5290 = vrcp.f32 %v3344_v45  ;;  %v3558_v8 = vadd.f32 %v3511_v53, %v3510_v59  ;;  %v4278_v59 = vmul.f32 -1.442695, %v4376_v58  ;;  %v4333_v45 = vadd.f32 %v6155_v13, %v6036_v4 }
 0x2ed   : > { %v5273_v2 = vpop.eup %5272  ;;  %5292 = vtanh.f32 %v4329_v57  ;;  %v3345_v38 = vadd.f32 1.0, %v5271_v49  ;;  %v3512_v7 = vmul.f32 %v6077_v21, %v3460_v10  ;;  %v4279_v53 = vmul.f32 -1.442695, %v4377_v1 }
 0x2ee   : > { %v5275_v3 = vpop.eup %5274  ;;  %5294 = vpow2.f32 %v4275_v46  ;;  %3559 = vadd.xlane.f32.xlu0 %v3558_v8  ;;  %v3461_v5 = vmul.f32 %v5273_v2, %v5269_v36  ;;  %v4334_v26 = vadd.f32 %v6169_v37, %v6030_v60  ;;  %v4379_v13 = vadd.f32 %v6207_v32, %v6025_v56 }
 0x2ef   : > { %v5277_v9 = vpop.eup %5276  ;;  %5296 = vrcp.f32 %v3345_v38  ;;  %v4280_v38 = vmul.f32 -1.442695, %v4378_v11  ;;  %v4380_v37 = vadd.f32 %v6211_v35, %v6023_v55 }
 0x2f0   : > { %v5279_v24 = vpop.eup %5278  ;;  %5298 = vtanh.f32 %v4330_v31  ;;  %v3346_v17 = vadd.f32 1.0, %v5277_v9  ;;  %v3513_v12 = vmul.f32 %v6084_v25, %v3461_v5  ;;  %v4335_v9 = vadd.f32 %v6175_v41, %v6036_v4 }
 0x2f1   : > { %v5281_v20 = vpop.eup %5280  ;;  %5300 = vpow2.f32 %v4276_v0  ;;  %v3462_v16 = vmul.f32 %v5279_v24, %v5275_v3  ;;  %v4281_v58 = vmul.f32 -1.442695, %v4379_v13  ;;  %v4381_v41 = vadd.f32 %v6219_v42, %v6025_v56 }
 0x2f2   : > { %v5283_v48 = vpop.eup %5282  ;;  %5302 = vrcp.f32 %v3346_v17  ;;  %v3561_v19 = vadd.f32 %v3513_v12, %v3512_v7  ;;  %v4339_v13 = vadd.f32 %v6205_v18, %v6036_v4  ;;  %v4385_v18 = vadd.f32 %v6246_v33, %v6025_v56 }
 0x2f3   : > { %v5285_v54 = vpop.eup %5284  ;;  %5304 = vtanh.f32 %v4331_v44  ;;  %v3347_v52 = vadd.f32 1.0, %v5283_v48  ;;  %v3514_v6 = vmul.f32 %v6077_v21, %v3462_v16 }
 0x2f4   : > { %v5287_v50 = vpop.eup %5286  ;;  %5306 = vpow2.f32 %v4277_v23  ;;  %3562 = vadd.xlane.f32.xlu1 %v3561_v19  ;;  %v3463_v57 = vmul.f32 %v5285_v54, %v5281_v20  ;;  %v4336_v20 = vadd.f32 %v6182_v51, %v6030_v60  ;;  %v4382_v51 = vadd.f32 %v6229_v15, %v6023_v55 }
 0x2f5   : > { %v5289_v39 = vpop.eup %5288  ;;  %5308 = vrcp.f32 %v3347_v52 }
 0x2f6   : > { %v5291_v40 = vpop.eup %5290  ;;  %5310 = vtanh.f32 %v4332_v28  ;;  %v3348_v46 = vadd.f32 1.0, %v5289_v39  ;;  %v3515_v36 = vmul.f32 %v6084_v25, %v3463_v57  ;;  %v4282_v28 = vmul.f32 -1.442695, %v4380_v37 }
 0x2f7   : > { %v5293_v10 = vpop.eup %5292  ;;  %5312 = vpow2.f32 %v4278_v59  ;;  %v3464_v49 = vmul.f32 %v5291_v40, %v5287_v50  ;;  %v4337_v59 = vadd.f32 %v6186_v63, %v6036_v4  ;;  %v4283_v57 = vmul.f32 -1.442695, %v4381_v41 }
 0x2f8   : > { %v5295_v31 = vpop.eup %5294  ;;  %5314 = vrcp.f32 %v3348_v46  ;;  %v3564_v8 = vadd.f32 %v3515_v36, %v3514_v6  ;;  %v4338_v40 = vadd.f32 %v6199_v47, %v6030_v60  ;;  %v4383_v63 = vadd.f32 %v6237_v34, %v6025_v56 }
 0x2f9   : > { %v5297_v2 = vpop.eup %5296  ;;  %5316 = vtanh.f32 %v4333_v45  ;;  %v3349_v27 = vadd.f32 1.0, %v5295_v31  ;;  %v3516_v5 = vmul.f32 %v6077_v21, %v3464_v49  ;;  %v4284_v36 = vmul.f32 -1.442695, %v4382_v51 }
 0x2fa   : > { %v5299_v0 = vpop.eup %5298  ;;  %5318 = vpow2.f32 %v4279_v53  ;;  %3565 = vadd.xlane.f32.xlu0 %v3564_v8  ;;  %v3465_v3 = vmul.f32 %v5297_v2, %v5293_v10  ;;  %v4384_v47 = vadd.f32 %v6241_v30, %v6023_v55  ;;  %v4285_v2 = vmul.f32 -1.442695, %v4383_v63 }
 0x2fb   : > { %v5301_v7 = vpop.eup %5300  ;;  %5320 = vrcp.f32 %v3349_v27  ;;  %v4287_v56 = vmul.f32 -1.442695, %v4385_v18 }
 0x2fc   : > { %v5303_v32 = vpop.eup %5302  ;;  %5322 = vtanh.f32 %v4334_v26  ;;  %v3350_v44 = vadd.f32 1.0, %v5301_v7  ;;  %v3517_v24 = vmul.f32 %v6084_v25, %v3465_v3  ;;  %v4286_v30 = vmul.f32 -1.442695, %v4384_v47 }
 0x2fd   : > { %v5305_v17 = vpop.eup %5304  ;;  %5324 = vpow2.f32 %v4280_v38  ;;  %v3466_v23 = vmul.f32 %v5303_v32, %v5299_v0 }
 0x2fe   : > { %v5307_v12 = vpop.eup %5306  ;;  %5326 = vrcp.f32 %v3350_v44  ;;  %v3567_v16 = vadd.f32 %v3517_v24, %v3516_v5  ;;  %v4340_v5 = vadd.f32 %v6209_v62, %v6030_v60  ;;  %v4341_v24 = vadd.f32 %v6217_v43, %v6036_v4 }
 0x2ff   : > { %v5309_v48 = vpop.eup %5308  ;;  %5328 = vtanh.f32 %v4335_v9  ;;  %v3351_v35 = vadd.f32 1.0, %v5307_v12  ;;  %v3518_v54 = vmul.f32 %v6077_v21, %v3466_v23 }
 0x300   : > { %v5311_v1 = vpop.eup %5310  ;;  %5330 = vpow2.f32 %v4281_v58  ;;  %3568 = vadd.xlane.f32.xlu1 %v3567_v16  ;;  %v3467_v19 = vmul.f32 %v5309_v48, %v5305_v17 }
 0x301   : > { %v5313_v52 = vpop.eup %5312  ;;  %5332 = vrcp.f32 %v3351_v35  ;;  %v4342_v35 = vadd.f32 %v6227_v61, %v6030_v60 }
 0x302   : > { %v5315_v42 = vpop.eup %5314  ;;  %5334 = vtanh.f32 %v4336_v20  ;;  %v3352_v50 = vadd.f32 1.0, %v5313_v52  ;;  %v3519_v6 = vmul.f32 %v6084_v25, %v3467_v19 }
 0x303   : > { %v5317_v39 = vpop.eup %5316  ;;  %5336 = vpow2.f32 %v4282_v28  ;;  %v3468_v45 = vmul.f32 %v5315_v42, %v5311_v1 }
 0x304   : > { %v5319_v11 = vpop.eup %5318  ;;  %5338 = vrcp.f32 %v3352_v50  ;;  %v3570_v46 = vadd.f32 %v3519_v6, %v3518_v54 }
 0x305   : > { %v5321_v53 = vpop.eup %5320  ;;  %5340 = vtanh.f32 %v4337_v59  ;;  %v3353_v15 = vadd.f32 1.0, %v5319_v11  ;;  %v3520_v31 = vmul.f32 %v6077_v21, %v3468_v45  ;;  %v4343_v59 = vadd.f32 %v6235_v22, %v6036_v4 }
 0x306   : > { %v5323_v10 = vpop.eup %5322  ;;  %5342 = vpow2.f32 %v4283_v57  ;;  %3571 = vadd.xlane.f32.xlu0 %v3570_v46  ;;  %v3469_v49 = vmul.f32 %v5321_v53, %v5317_v39  ;;  %v4344_v45 = vadd.f32 %v6239_v29, %v6030_v60 }
 0x307   : > { %v5325_v26 = vpop.eup %5324  ;;  %5344 = vrcp.f32 %v3353_v15  ;;  %v4345_v15 = vadd.f32 %v6244_v14, %v6036_v4 }
 0x308   : > { %v5327_v34 = vpop.eup %5326  ;;  %5346 = vtanh.f32 %v4338_v40  ;;  %v3354_v8 = vadd.f32 1.0, %v5325_v26  ;;  %v3521_v27 = vmul.f32 %v6084_v25, %v3469_v49 }
 0x309   : > { %v5329_v38 = vpop.eup %5328  ;;  %5348 = vpow2.f32 %v4284_v36  ;;  %v3470_v0 = vmul.f32 %v5327_v34, %v5323_v10 }
 0x30a   : > { %v5331_v3 = vpop.eup %5330  ;;  %5350 = vrcp.f32 %v3354_v8  ;;  %v3573_v7 = vadd.f32 %v3521_v27, %v3520_v31 }
 0x30b   : > { %v5333_v9 = vpop.eup %5332  ;;  %5352 = vtanh.f32 %v4339_v13  ;;  %v3355_v55 = vadd.f32 1.0, %v5331_v3  ;;  %v3522_v44 = vmul.f32 %v6077_v21, %v3470_v0 }
 0x30c   : > { %v5335_v37 = vpop.eup %5334  ;;  %5354 = vpow2.f32 %v4285_v2  ;;  %3574 = vadd.xlane.f32.xlu1 %v3573_v7  ;;  %v3471_v32 = vmul.f32 %v5333_v9, %v5329_v38 }
 0x30d   : > { %v5337_v58 = vpop.eup %5336  ;;  %5356 = vrcp.f32 %v3355_v55 }
 0x30e   : > { %v5339_v62 = vpop.eup %5338  ;;  %5358 = vtanh.f32 %v4340_v5  ;;  %v3356_v17 = vadd.f32 1.0, %v5337_v58  ;;  %v3523_v33 = vmul.f32 %v6084_v25, %v3471_v32 }
 0x30f   : > { %v5341_v23 = vpop.eup %5340  ;;  %5360 = vpow2.f32 %v4286_v30  ;;  %v3472_v12 = vmul.f32 %v5339_v62, %v5335_v37  ;;  %v4288_v62 = vld [vmem:[#allocation2] ss:$0 sm:$0xff] }
 0x310   : > { %v5343_v20 = vpop.eup %5342  ;;  %5362 = vrcp.f32 %v3356_v17  ;;  %v3576_v41 = vadd.f32 %v3523_v33, %v3522_v44 }
 0x311   : > { %v5345_v16 = vpop.eup %5344  ;;  %5364 = vtanh.f32 %v4341_v24  ;;  %v3357_v48 = vadd.f32 1.0, %v5343_v20  ;;  %v3524_v1 = vmul.f32 %v6077_v21, %v3472_v12 }
 0x312   : > { %v5347_v28 = vpop.eup %5346  ;;  %5366 = vpow2.f32 %v4287_v56  ;;  %3577 = vadd.xlane.f32.xlu0 %v3576_v41  ;;  %v3473_v43 = vmul.f32 %v5345_v16, %v5341_v23 }
 0x313   : > { %v5349_v19 = vpop.eup %5348  ;;  %5368 = vrcp.f32 %v3357_v48 }
 0x314   : > { %v5351_v54 = vpop.eup %5350  ;;  %v3358_v52 = vadd.f32 1.0, %v5349_v19  ;;  %v3525_v51 = vmul.f32 %v6084_v25, %v3473_v43  ;;  %5370 = vtanh.f32 %v4342_v35 }
 0x315   : > { %v5353_v42 = vpop.eup %5352  ;;  %v3474_v50 = vmul.f32 %v5351_v54, %v5347_v28 }
 0x316   : > { %v5355_v57 = vpop.eup %5354  ;;  %5372 = vrcp.f32 %v3358_v52  ;;  %v3579_v61 = vadd.f32 %v3525_v51, %v3524_v1 }
 0x317   : > { %v5357_v6 = vpop.eup %5356  ;;  %v3359_v39 = vadd.f32 1.0, %v5355_v57  ;;  %5374 = vtanh.f32 %v4343_v59  ;;  %v3526_v63 = vmul.f32 %v6077_v21, %v3474_v50 }
 0x318   : > { %v5359_v11 = vpop.eup %5358  ;;  %3580 = vadd.xlane.f32.xlu1 %v3579_v61  ;;  %v3475_v40 = vmul.f32 %v5357_v6, %v5353_v42 }
 0x319   : > { %v5361_v22 = vpop.eup %5360  ;;  %5376 = vrcp.f32 %v3359_v39 }
 0x31a   : > { %v5363_v46 = vpop.eup %5362  ;;  %v3360_v53 = vadd.f32 1.0, %v5361_v22  ;;  %v3527_v36 = vmul.f32 %v6084_v25, %v3475_v40  ;;  %5378 = vtanh.f32 %v4344_v45 }
 0x31b   : > { %v5365_v10 = vpop.eup %5364  ;;  %v3476_v49 = vmul.f32 %v5363_v46, %v5359_v11 }
 0x31c   : > { %v5367_v31 = vpop.eup %5366  ;;  %5380 = vrcp.f32 %v3360_v53  ;;  %v3582_v60 = vadd.f32 %v3527_v36, %v3526_v63 }
 0x31d   : > { %v5369_v29 = vpop.eup %5368  ;;  %v3361_v26 = vadd.f32 1.0, %v5367_v31  ;;  %5382 = vtanh.f32 %v4345_v15  ;;  %v3528_v47 = vmul.f32 %v6077_v21, %v3476_v49 }
 0x31e   : > { %3583 = vadd.xlane.f32.xlu0 %v3582_v60  ;;  %v3477_v13 = vmul.f32 %v5369_v29, %v5365_v10  ;;  %v5371_v34 = vpop.eup %5370 }
 0x31f   : > { %5384 = vrcp.f32 %v3361_v26 }
 0x320   : > { %v5373_v8 = vpop.eup %5372  ;;  %v3529_v4 = vmul.f32 %v6084_v25, %v3477_v13 }
 0x321   : > { %v3478_v14 = vmul.f32 %v5373_v8, %v5371_v34  ;;  %v5375_v2 = vpop.eup %5374 }
 0x322   : > { %v3585_v27 = vadd.f32 %v3529_v4, %v3528_v47 }
 0x323   : > { %v5377_v38 = vpop.eup %5376  ;;  %v3530_v3 = vmul.f32 %v6077_v21, %v3478_v14 }
 0x324   : > { %3586 = vadd.xlane.f32.xlu1 %v3585_v27  ;;  %v3479_v0 = vmul.f32 %v5377_v38, %v5375_v2  ;;  %v5379_v5 = vpop.eup %5378 }
 0x326   : > { %v5381_v18 = vpop.eup %5380  ;;  %v3531_v7 = vmul.f32 %v6084_v25, %v3479_v0 }
 0x327   : > { %v3480_v9 = vmul.f32 %v5381_v18, %v5379_v5  ;;  %v5383_v55 = vpop.eup %5382 }
 0x328   : > { %v3588_v30 = vadd.f32 %v3531_v7, %v3530_v3 }
 0x329   : > { %v5385_v37 = vpop.eup %5384  ;;  %v3532_v44 = vmul.f32 %v6077_v21, %v3480_v9 }
 0x32a   : > { %3589 = vadd.xlane.f32.xlu0 %v3588_v30  ;;  %v3481_v32 = vmul.f32 %v5385_v37, %v5383_v55 }
 0x32c   : > { %v3533_v58 = vmul.f32 %v6084_v25, %v3481_v32 }
 0x32e   : > { %v3591_v24 = vadd.f32 %v3533_v58, %v3532_v44 }
 0x330   : > { %3592 = vadd.xlane.f32.xlu1 %v3591_v24 }
 0x34d   : > { %v3536_v17 = vpop.xlane.xlu0 %3535 }
 0x34e   : > { %v3601_v56 = vadd.f32 %v4288_v62, %v3536_v17 }
 0x350   : > { %3622 = vst.msk [vmem:[%s6330_s6] sm:$0xff] %vm3621_vm0, %v3601_v56 }
 0x351   : > { %v3539_v21 = vpop.xlane.xlu0 %3538 }
 0x352   : > { %v3602_v33 = vadd.f32 %v4288_v62, %v3539_v21 }
 0x354   : > { %3623 = vst.msk [vmem:[%s6330_s6 + $0x8] sm:$0xff] %vm3621_vm0, %v3602_v33 }
 0x356   : > { %v3542_v25 = vpop.xlane.xlu1 %3541 }
 0x357   : > { %v3603_v23 = vadd.f32 %v4288_v62, %v3542_v25 }
 0x359   : > { %3624 = vst.msk [vmem:[%s6330_s6 + $0x10] sm:$0xff] %vm3621_vm0, %v3603_v23 }
 0x35b   : > { %v3545_v12 = vpop.xlane.xlu1 %3544 }
 0x35c   : > { %v3604_v20 = vadd.f32 %v4288_v62, %v3545_v12 }
 0x35e   : > { %3625 = vst.msk [vmem:[%s6330_s6 + $0x18] sm:$0xff] %vm3621_vm0, %v3604_v20 }
 0x364   : > { %v3548_v41 = vpop.xlane.xlu0 %3547 }
 0x365   : > { %v3605_v16 = vadd.f32 %v4288_v62, %v3548_v41 }
 0x367   : > { %3626 = vst.msk [vmem:[%s6330_s6 + $0x20] sm:$0xff] %vm3621_vm0, %v3605_v16 }
 0x36a   : > { %v3551_v48 = vpop.xlane.xlu1 %3550 }
 0x36b   : > { %v3606_v35 = vadd.f32 %v4288_v62, %v3551_v48 }
 0x36d   : > { %3627 = vst.msk [vmem:[%s6330_s6 + $0x28] sm:$0xff] %vm3621_vm0, %v3606_v35 }
 0x36f   : > { %v3554_v28 = vpop.xlane.xlu0 %3553 }
 0x370   : > { %v3607_v43 = vadd.f32 %v4288_v62, %v3554_v28 }
 0x372   : > { %3628 = vst.msk [vmem:[%s6330_s6 + $0x30] sm:$0xff] %vm3621_vm0, %v3607_v43 }
 0x375   : > { %v3557_v1 = vpop.xlane.xlu1 %3556 }
 0x376   : > { %v3608_v19 = vadd.f32 %v4288_v62, %v3557_v1 }
 0x378   : > { %3629 = vst.msk [vmem:[%s6330_s6 + $0x38] sm:$0xff] %vm3621_vm0, %v3608_v19 }
 0x37b   : > { %v3560_v54 = vpop.xlane.xlu0 %3559 }
 0x37c   : > { %v3609_v52 = vadd.f32 %v4288_v62, %v3560_v54 }
 0x37e   : > { %3630 = vst.msk [vmem:[%s6330_s6 + $0x40] sm:$0xff] %vm3621_vm0, %v3609_v52 }
 0x381   : > { %v3563_v59 = vpop.xlane.xlu1 %3562 }
 0x382   : > { %v3610_v51 = vadd.f32 %v4288_v62, %v3563_v59 }
 0x384   : > { %3631 = vst.msk [vmem:[%s6330_s6 + $0x48] sm:$0xff] %vm3621_vm0, %v3610_v51 }
 0x387   : > { %v3566_v42 = vpop.xlane.xlu0 %3565 }
 0x388   : > { %v3611_v50 = vadd.f32 %v4288_v62, %v3566_v42 }
 0x38a   : > { %3632 = vst.msk [vmem:[%s6330_s6 + $0x50] sm:$0xff] %vm3621_vm0, %v3611_v50 }
 0x38d   : > { %v3569_v57 = vpop.xlane.xlu1 %3568 }
 0x38e   : > { %v3612_v61 = vadd.f32 %v4288_v62, %v3569_v57 }
 0x390   : > { %3633 = vst.msk [vmem:[%s6330_s6 + $0x58] sm:$0xff] %vm3621_vm0, %v3612_v61 }
 0x393   : > { %v3572_v6 = vpop.xlane.xlu0 %3571 }
 0x394   : > { %v3613_v39 = vadd.f32 %v4288_v62, %v3572_v6 }
 0x396   : > { %3634 = vst.msk [vmem:[%s6330_s6 + $0x60] sm:$0xff] %vm3621_vm0, %v3613_v39 }
 0x399   : > { %v3575_v45 = vpop.xlane.xlu1 %3574 }
 0x39a   : > { %v3614_v11 = vadd.f32 %v4288_v62, %v3575_v45 }
 0x39c   : > { %3635 = vst.msk [vmem:[%s6330_s6 + $0x68] sm:$0xff] %vm3621_vm0, %v3614_v11 }
 0x39f   : > { %v3578_v40 = vpop.xlane.xlu0 %3577 }
 0x3a0   : > { %v3615_v63 = vadd.f32 %v4288_v62, %v3578_v40 }
 0x3a2   : > { %3636 = vst.msk [vmem:[%s6330_s6 + $0x70] sm:$0xff] %vm3621_vm0, %v3615_v63 }
 0x3a5   : > { %v3581_v22 = vpop.xlane.xlu1 %3580 }
 0x3a6   : > { %v3616_v46 = vadd.f32 %v4288_v62, %v3581_v22 }
 0x3a8   : > { %3637 = vst.msk [vmem:[%s6330_s6 + $0x78] sm:$0xff] %vm3621_vm0, %v3616_v46 }
 0x3ab   : > { %v3584_v53 = vpop.xlane.xlu0 %3583 }
 0x3ac   : > { %v3617_v15 = vadd.f32 %v4288_v62, %v3584_v53 }
 0x3ae   : > { %3638 = vst.msk [vmem:[%s6330_s6 + $0x80] sm:$0xff] %vm3621_vm0, %v3617_v15 }
 0x3b1   : > { %v3587_v36 = vpop.xlane.xlu1 %3586 }
 0x3b2   : > { %v3618_v10 = vadd.f32 %v4288_v62, %v3587_v36 }
 0x3b4   : > { %3639 = vst.msk [vmem:[%s6330_s6 + $0x88] sm:$0xff] %vm3621_vm0, %v3618_v10 }
 0x3b7   : > { %v3590_v49 = vpop.xlane.xlu0 %3589 }
 0x3b8   : > { %v3619_v31 = vadd.f32 %v4288_v62, %v3590_v49 }
 0x3ba   : > { %3640 = vst.msk [vmem:[%s6330_s6 + $0x90] sm:$0xff] %vm3621_vm0, %v3619_v31  ;;  %3648 = sbr.rel (!%p6500_p8) target bundleno = 1024 (0x400), region = 60 }
 0x3bd   : > { %v3593_v60 = vpop.xlane.xlu1 %3592 }
 0x3be   : > { %v3620_v29 = vadd.f32 %v4288_v62, %v3593_v60 }
 0x3c0   : > { %3641 = vst.msk [vmem:[%s6330_s6 + $0x98] sm:$0xff] %vm3621_vm0, %v3620_v29 }
 0x3c1   : > { %s6511_s15 = smov (!%p3651_p5, %s3650_s15), 20 }
 0x3c2   : > { %s4289_s26 = sshll.u32 %s6511_s15, 7 }
 0x3c3   : > { %p4292_p10 = scmp.eq.s32.totalorder %s4289_s26, 0 }
 0x3c4   : > { %5386 = sdivrem.u32 (!%p4292_p10), %s6511_s15, 20 }
 0x3c5   : > { %3659 = sbr.rel (%p4292_p10) target bundleno = 1024 (0x400), region = 64 }
 0x3cd   : > { %s6385_s30 = spop.drf %5386 }
 0x3ce   : > { %p4293_p3 = scmp.le.s32.totalorder %s6385_s30, 0 }
 0x3cf   : > { %s6501_s4 = smov (!%p4293_p3), %s6379_s23  ;;  %s6502_s19 = smov (!%p4293_p3), %s6330_s6 }
 0x3d0   : > { %3901 = sbr.rel (%p4293_p3) target bundleno = 995 (0x3e3), region = 146  ;;  %s6394_s8 = smov (!%p4293_p3), 0  }
 0x3d1   : > { %s6396_s7 = smov (!%p4293_p3), 0  }
 0x3d7 LB: >> { %v3761_v26 = vld [vmem:[%s5584_s19] sm:$0xff]  ;;  %v3763_v13 = vld [vmem:[%s5584_s19 + $0x8] sm:$0xff]  ;;  %v3765_v47 = vld [vmem:[%s5584_s19 + $0x10] sm:$0xff]  ;;  %s3801_s10 = sadd.s32 1, %s5588_s8  ;;  %s3755_s7 = sadd.s32 1, %s5592_s7   ;;  %s5592_s7 = sphi %s6396_s7, %s3755_s7   ;;  %s5588_s8 = sphi %s6394_s8, %s6503_s8   ;;  %s5584_s19 = sphi %s6502_s19, %s3806_s19   ;;  %s5580_s4 = sphi %s6501_s4, %s3807_s4  }
 0x3d8   : >> { %3762 = vst [vmem:[%s5580_s4] sm:$0xff] %v3761_v26  ;;  %3764 = vst [vmem:[%s5580_s4 + $0x8] sm:$0xff] %v3763_v13  ;;  %v3767_v34 = vld [vmem:[%s5584_s19 + $0x18] sm:$0xff]  ;;  %v3769_v8 = vld [vmem:[%s5584_s19 + $0x20] sm:$0xff]  ;;  %p3802_p11 = scmp.ge.s32.totalorder %s3801_s10, %s6385_s30  ;;  %p3754_p13 = scmp.ge.s32.totalorder %s3755_s7, %s6385_s30 }
 0x3d9   : >> { %3766 = vst [vmem:[%s5580_s4 + $0x10] sm:$0xff] %v3765_v47  ;;  %v3771_v4 = vld [vmem:[%s5584_s19 + $0x28] sm:$0xff]  ;;  %3768 = vst [vmem:[%s5580_s4 + $0x18] sm:$0xff] %v3767_v34  ;;  %v3773_v14 = vld [vmem:[%s5584_s19 + $0x30] sm:$0xff] }
 0x3da   : >> { %3770 = vst [vmem:[%s5580_s4 + $0x20] sm:$0xff] %v3769_v8  ;;  %3772 = vst [vmem:[%s5580_s4 + $0x28] sm:$0xff] %v3771_v4  ;;  %v3775_v2 = vld [vmem:[%s5584_s19 + $0x38] sm:$0xff]  ;;  %v3777_v27 = vld [vmem:[%s5584_s19 + $0x40] sm:$0xff]  ;;  %s6513_s10 = smov (%p3802_p11, %s3801_s10), 0 }
 0x3db   : >> { %3774 = vst [vmem:[%s5580_s4 + $0x30] sm:$0xff] %v3773_v14  ;;  %3776 = vst [vmem:[%s5580_s4 + $0x38] sm:$0xff] %v3775_v2  ;;  %v3779_v38 = vld [vmem:[%s5584_s19 + $0x48] sm:$0xff]  ;;  %v3781_v0 = vld [vmem:[%s5584_s19 + $0x50] sm:$0xff]  ;;  %s3804_s9 = smul.u32 160, %s6513_s10  ;;  %s6503_s8 = smov %s6513_s10 }
 0x3dc   : >> { %3778 = vst [vmem:[%s5580_s4 + $0x40] sm:$0xff] %v3777_v27  ;;  %v3783_v3 = vld [vmem:[%s5584_s19 + $0x58] sm:$0xff]  ;;  %3780 = vst [vmem:[%s5580_s4 + $0x48] sm:$0xff] %v3779_v38  ;;  %v3785_v5 = vld [vmem:[%s5584_s19 + $0x60] sm:$0xff]  ;;  %3757 = sbr.rel (!%p3754_p13) target bundleno = 983 (0x3d7), region = 152 }
 0x3dd   : >> { %3782 = vst [vmem:[%s5580_s4 + $0x50] sm:$0xff] %v3781_v0  ;;  %3784 = vst [vmem:[%s5580_s4 + $0x58] sm:$0xff] %v3783_v3  ;;  %v3787_v18 = vld [vmem:[%s5584_s19 + $0x68] sm:$0xff]  ;;  %v3789_v7 = vld [vmem:[%s5584_s19 + $0x70] sm:$0xff] }
 0x3de   : >> { %3786 = vst [vmem:[%s5580_s4 + $0x60] sm:$0xff] %v3785_v5  ;;  %3788 = vst [vmem:[%s5580_s4 + $0x68] sm:$0xff] %v3787_v18  ;;  %v3791_v9 = vld [vmem:[%s5584_s19 + $0x78] sm:$0xff]  ;;  %v3793_v55 = vld [vmem:[%s5584_s19 + $0x80] sm:$0xff] }
 0x3df   : >> { %3790 = vst [vmem:[%s5580_s4 + $0x70] sm:$0xff] %v3789_v7  ;;  %v3795_v30 = vld [vmem:[%s5584_s19 + $0x88] sm:$0xff]  ;;  %3792 = vst [vmem:[%s5580_s4 + $0x78] sm:$0xff] %v3791_v9  ;;  %v3797_v37 = vld [vmem:[%s5584_s19 + $0x90] sm:$0xff] }
 0x3e0   : >> { %3794 = vst [vmem:[%s5580_s4 + $0x80] sm:$0xff] %v3793_v55  ;;  %3796 = vst [vmem:[%s5580_s4 + $0x88] sm:$0xff] %v3795_v30  ;;  %v3799_v32 = vld [vmem:[%s5584_s19 + $0x98] sm:$0xff]  ;;  %s3806_s19 = scalar_lea.vmem %s6330_s6, %s3804_s9 [#allocation10]  }
 0x3e1   : >> { %3798 = vst [vmem:[%s5580_s4 + $0x90] sm:$0xff] %v3797_v37  ;;  %3800 = vst [vmem:[%s5580_s4 + $0x98] sm:$0xff] %v3799_v32  ;;  %s3807_s4 = scalar_lea.vmem %s6379_s23, %s3804_s9  }
 0x3e3 PF: > { %5388 = sdivrem.u32 %s6511_s15, 20 }
 0x3e4   : > { %s4294_s13 = smul.u32 160, %s6385_s30 }
 0x3e6   : > { %s3812_s28 = scalar_lea.vmem %s6330_s6, %s4294_s13 [#allocation10]   ;;  %s3814_s16 = scalar_lea.vmem %s6379_s23, %s4294_s13  }
 0x3ec   : > { %s5389_s17 = spop.drf %5388 }
 0x3ed   : > { %p4296_p1 = scmp.le.s32.totalorder %s5389_s17, 0 }
 0x3ee   : > { %s5594_s20 = smov (!%p4296_p1), %s3814_s16   ;;  %s5598_s25 = smov (!%p4296_p1), %s3812_s28  }
 0x3ef   : > { %3915 = sbr.rel (%p4296_p1) target bundleno = 1024 (0x400), region = 157  ;;  %s5602_s29 = smov (!%p4296_p1), 0  }
 0x3f0   : > { %s5606_s12 = smov (!%p4296_p1), 0  }
 0x3f6 LB: >> { %v3824_v44 = vld [vmem:[%s5600_s25] sm:$0xff]  ;;  %s3826_s14 = sadd.s32 1, %s5604_s29  ;;  %s3818_s12 = sadd.s32 1, %s5608_s12   ;;  %s5608_s12 = sphi %s5606_s12, %s3818_s12   ;;  %s5604_s29 = sphi %s5602_s29, %s5603_s29   ;;  %s5600_s25 = sphi %s5598_s25, %s3831_s25   ;;  %s5596_s20 = sphi %s5594_s20, %s3832_s20  }
 0x3f7   : >> { %3825 = vst [vmem:[%s5596_s20] sm:$0xff] %v3824_v44  ;;  %p3827_p7 = scmp.ge.s32.totalorder %s3826_s14, %s5389_s17  ;;  %p3817_p6 = scmp.ge.s32.totalorder %s3818_s12, %s5389_s17 }
 0x3f9   : >> { %s6515_s14 = smov (%p3827_p7, %s3826_s14), 0  ;;  %3820 = sbr.rel (!%p3817_p6) target bundleno = 1014 (0x3f6), region = 163 }
 0x3fa   : >> { %s4297_s6 = sshll.u32 %s6515_s14, 3  ;;  %s5603_s29 = smov %s6515_s14  }
 0x3fb   : >> { %s3831_s25 = scalar_lea.vmem %s3812_s28, %s4297_s6 [#allocation10]   ;;  %s3832_s20 = scalar_lea.vmem %s3814_s16, %s4297_s6  }
 0x400 PF: > { %p19_p9 = scmp.ge.s32.totalorder %s5673_s24, 4   ;;  %s6504_s20 = smov %s5568_s21 }
 0x401   : > { %s6505_s21 = smov %s5572_s22  ;;  %s6506_s22 = smov %s5683_s27 }
 0x402   : > { %s6507_s23 = smov %s5673_s24  ;;  %21 = sbr.rel (!%p19_p9) target bundleno = 8 (0x8), region = 174 }
 0x409   :  { %3848 = vsyncpa [#allocation4], 1 }
 0x40a   :  { %3850 = vsyncpa [#allocation4 + $0x1], 1 }
 0x40b   :  { %3851 = vsyncpa [#allocation6], 1 }
 0x40c   :  { %3852 = vsyncpa [#allocation9], 1 }

</bundles_post_ra>
